<compile_context>
chip_gen: v5e
topology: v5e:2x2
jax: 0.10.0
libtpu: 0.0.40
codegen_flags: <defaults>
</compile_context>

<pallas_src>
import functools
import math

import jax
import jax.numpy as jnp
from jax.experimental import pallas as pl
from jax.experimental.pallas import tpu as pltpu


# ----------------------------- in-kernel helpers -----------------------------

def _layer_norm(x, gamma, beta, eps=1e-5):
    # x: (rows, W) f32; gamma/beta: (1, W) f32  -- biased variance, like torch.nn.LayerNorm
    m = jnp.mean(x, axis=-1, keepdims=True)
    d = x - m
    var = jnp.mean(d * d, axis=-1, keepdims=True)
    return d * jax.lax.rsqrt(var + eps) * gamma + beta


_SQRT1_2 = 0.7071067811865476


def _gelu_exact(x):
    # torch.nn.GELU() default = exact erf-based GELU
    return 0.5 * x * (1.0 + jax.lax.erf(x * _SQRT1_2))


# ----------------------------- the Pallas kernel -----------------------------
# grid = (B // block_b, num_layers).  One grid step = one full ResidualCrossAttentionBlock
# applied to block_b batch elements.  The residual stream is carried across the layer axis
# in a VMEM scratch (loaded from x at layer 0, written to out at the last layer).

def _cross_block_stack_kernel(
    x_ref, kv_ref, mask_ref,
    g1_ref, b1_ref, g2_ref, b2_ref,
    wq_ref, bq_ref, wk_ref, bk_ref, wv_ref, bv_ref,
    wo_ref, bo_ref,
    g3_ref, b3_ref,
    wfc_ref, bfc_ref, wpr_ref, bpr_ref,
    out_ref,
    xacc_ref,
    *, heads):
    layer = pl.program_id(1)
    n_layers = pl.num_programs(1)

    Bb, Lq, W = out_ref.shape
    Lkv = kv_ref.shape[1]
    Dh = W // heads
    cdt = wq_ref.dtype                 # MXU operand dtype (bf16)

    # Load the residual stream into the carried scratch at the first layer of this batch block.
    @pl.when(layer == 0)
    def _():
        xacc_ref[...] = x_ref[...].reshape(Bb * Lq, W).astype(jnp.float32)

    x = xacc_ref[...]                                             # (Bb*Lq, W) f32
    kv = kv_ref[...].astype(jnp.float32).reshape(Bb * Lkv, W)     # (Bb*Lkv, W) f32
    mask = mask_ref[...].astype(jnp.float32)                      # (Bb, 1, Lkv) additive bias

    # pre-norms (f32 stats)
    q = _layer_norm(x, g1_ref[0], b1_ref[0])
    kvn = _layer_norm(kv, g2_ref[0], b2_ref[0])

    # QKV projections on the flattened row slab (bf16 in, f32 acc).
    # 1/sqrt(Dh) is already folded into wq / bq on the host.
    Q = jnp.dot(q.astype(cdt), wq_ref[0], preferred_element_type=jnp.float32) + bq_ref[0]
    K = jnp.dot(kvn.astype(cdt), wk_ref[0], preferred_element_type=jnp.float32) + bk_ref[0]
    V = jnp.dot(kvn.astype(cdt), wv_ref[0], preferred_element_type=jnp.float32) + bv_ref[0]

    # Regroup heads into a single batch dim z = (head, batch): (heads*Bb, L, Dh).
    # TODO(synk): a single 4-D transpose / head-batched einsum would avoid these per-head
    # lane slices once Mosaic's arbitrary-permutation transpose is guaranteed; the slice +
    # leading-dim concat form below is the lowering-safe variant.
    def to_heads(t, Lt):
        t3 = t.reshape(Bb, Lt, W)
        return jnp.concatenate(
            [t3[:, :, h * Dh:(h + 1) * Dh] for h in range(heads)], axis=0)

    Qz = to_heads(Q, Lq).astype(cdt)       # (heads*Bb, Lq, Dh)
    Kz = to_heads(K, Lkv).astype(cdt)      # (heads*Bb, Lkv, Dh)
    Vz = to_heads(V, Lkv).astype(cdt)      # (heads*Bb, Lkv, Dh)

    # Batched attention: one MXU einsum per stage, one softmax over all heads.
    s = jnp.einsum('zqd,zkd->zqk', Qz, Kz, preferred_element_type=jnp.float32)
    s = s + jnp.concatenate([mask] * heads, axis=0)               # key_padding_mask bias
    s = s - jnp.max(s, axis=-1, keepdims=True)
    p = jnp.exp(s)
    p = p * pl.reciprocal(jnp.sum(p, axis=-1, keepdims=True), approx=True)
    o = jnp.einsum('zqk,zkd->zqd', p.astype(cdt), Vz,
                   preferred_element_type=jnp.float32)            # (heads*Bb, Lq, Dh)

    # Back to (Bb*Lq, W): heads side by side along lanes.
    attn = jnp.concatenate(
        [o[h * Bb:(h + 1) * Bb] for h in range(heads)], axis=-1).reshape(Bb * Lq, W)
    attn = jnp.dot(attn.astype(cdt), wo_ref[0],
                   preferred_element_type=jnp.float32) + bo_ref[0]
    x1 = x + attn                                                 # residual 1

    # MLP branch.
    h3 = _layer_norm(x1, g3_ref[0], b3_ref[0])
    fc = jnp.dot(h3.astype(cdt), wfc_ref[0],
                 preferred_element_type=jnp.float32) + bfc_ref[0]
    act = _gelu_exact(fc)
    mlp = jnp.dot(act.astype(cdt), wpr_ref[0],
                  preferred_element_type=jnp.float32) + bpr_ref[0]
    x2 = x1 + mlp                                                 # residual 2

    xacc_ref[...] = x2                                            # carry to next layer

    @pl.when(layer == n_layers - 1)
    def _():
        out_ref[...] = x2.reshape(Bb, Lq, W).astype(out_ref.dtype)


# ----------------------------- host-side wrappers -----------------------------

_PARAM_ORDER = ("g1", "b1", "g2", "b2",
                "wq", "bq", "wk", "bk", "wv", "bv",
                "wo", "bo",
                "g3", "b3",
                "wfc", "bfc", "wpr", "bpr")


def _stack_and_prepare_params(layer_params, heads, compute_dtype):
    """Stack per-layer params along a leading layer axis, fold 1/sqrt(Dh) into wq/bq,
    cast weight matrices to the MXU compute dtype (biases / LN params stay f32)."""
    W = layer_params[0]["wq"].shape[0]
    scale = 1.0 / math.sqrt(W // heads)
    stack = lambda name: jnp.stack([p[name] for p in layer_params], axis=0)
    out = {}
    for name in ("g1", "b1", "g2", "b2", "g3", "b3",
                 "bk", "bv", "bo", "bfc", "bpr"):
        out[name] = stack(name).astype(jnp.float32)
    out["bq"] = (stack("bq") * scale).astype(jnp.float32)
    out["wq"] = (stack("wq") * scale).astype(compute_dtype)
    for name in ("wk", "wv", "wo", "wfc", "wpr"):
        out[name] = stack(name).astype(compute_dtype)
    return out


def _choose_block_b(B, Lq, target_rows=256):
    divisors = [d for d in range(1, B + 1) if B % d == 0]
    # Keep >=2 parallel grid steps when possible (megacore sharding / pipelining).
    cands = [d for d in divisors if B // d >= 2] or divisors
    fitting = [d for d in cands if d * Lq <= max(target_rows, Lq)]
    return max(fitting) if fitting else min(cands)


def cross_attention_blocks(q, kv, layer_params, *, heads,
                           key_padding_mask=None,
                           compute_dtype=jnp.bfloat16,
                           block_b=None):
    """Equivalent of stacking ResidualCrossAttentionBlock.forward (dropout p=0)."""
    B, Lq, W = q.shape
    Lkv = kv.shape[1]
    n_layers = len(layer_params)
    assert W % heads == 0

    if key_padding_mask is None:
        mask_bias = jnp.zeros((B, 1, Lkv), jnp.float32)
    else:
        # True == ignore this key position -> large negative additive bias (scores are f32).
        mask_bias = jnp.where(key_padding_mask, -1e30, 0.0).astype(
            jnp.float32).reshape(B, 1, Lkv)

    stacked = _stack_and_prepare_params(layer_params, heads, compute_dtype)
    weight_args = [stacked[name] for name in _PARAM_ORDER]

    if block_b is None:
        block_b = _choose_block_b(B, Lq)
    assert B % block_b == 0
    rows = block_b * Lq

    def _weight_spec(w):
        nrest = w.ndim - 1
        return pl.BlockSpec((1,) + w.shape[1:],
                            lambda b, l, _n=nrest: (l,) + (0,) * _n)

    in_specs = [
        pl.BlockSpec((block_b, Lq, W), lambda b, l: (b, 0, 0)),     # x
        pl.BlockSpec((block_b, Lkv, W), lambda b, l: (b, 0, 0)),    # kv
        pl.BlockSpec((block_b, 1, Lkv), lambda b, l: (b, 0, 0)),    # mask bias
    ] + [_weight_spec(w) for w in weight_args]
    out_spec = pl.BlockSpec((block_b, Lq, W), lambda b, l: (b, 0, 0))

    # --- explicit VMEM budget (double-buffered IO/weights + intermediates, capped for v7x) ---
    cdt_b = jnp.dtype(compute_dtype).itemsize
    in_b = jnp.dtype(q.dtype).itemsize
    w_bytes = 12 * W * W * cdt_b + 15 * W * 4            # per-layer weight block bytes
    io_bytes = (2 * rows * W + block_b * Lkv * W) * in_b + block_b * Lkv * 4
    act_bytes = 4 * (6 * rows * W + 3 * block_b * Lkv * W
                     + 3 * heads * block_b * Lq * Lkv + 2 * rows * 4 * W)
    vmem_est = 2 * (w_bytes + io_bytes) + act_bytes + rows * W * 4
    vmem_limit = int(min(64 * 1024 * 1024, max(32 * 1024 * 1024, 2 * vmem_est)))

    # --- advisory cost estimate so XLA can schedule around the custom call ---
    flops = n_layers * (2 * B * Lq * W * W + 4 * B * Lkv * W * W + 2 * B * Lq * W * W
                        + 4 * B * Lq * Lkv * W + 16 * B * Lq * W * W)
    transcend = n_layers * (B * heads * Lq * Lkv + 4 * B * Lq * W + 3 * B * Lq + B * Lkv)
    bytes_acc = (n_layers * w_bytes
                 + (2 * B * Lq * W + B * Lkv * W) * in_b + B * Lkv * 4)

    grid_spec = pltpu.PrefetchScalarGridSpec(
        num_scalar_prefetch=0,
        grid=(B // block_b, n_layers),
        in_specs=in_specs,
        out_specs=out_spec,
        scratch_shapes=[pltpu.VMEM((rows, W), jnp.float32)],
    )

    return pl.pallas_call(
        functools.partial(_cross_block_stack_kernel, heads=heads),
        out_shape=jax.ShapeDtypeStruct((B, Lq, W), q.dtype),
        grid_spec=grid_spec,
        compiler_params=pltpu.CompilerParams(
            dimension_semantics=("parallel", "arbitrary"),
            vmem_limit_bytes=vmem_limit),
        cost_estimate=pl.CostEstimate(flops=int(flops),
                                      transcendentals=int(transcend),
                                      bytes_accessed=int(bytes_acc)),
    )(q, kv, mask_bias, *weight_args)


def residual_cross_attention_block(x, kv, params, *, heads, key_padding_mask=None,
                                   compute_dtype=jnp.bfloat16):
    """Single ResidualCrossAttentionBlock.forward."""
    return cross_attention_blocks(x, kv, [params], heads=heads,
                                  key_padding_mask=key_padding_mask,
                                  compute_dtype=compute_dtype)


# ----------------------------- pure-JAX reference (f32) -----------------------------

def _ref_layer(x, kv, p, heads, mask_bias):
    B, Lq, W = x.shape
    Lkv = kv.shape[1]
    Dh = W // heads

    def ln(t, g, b):
        m = jnp.mean(t, axis=-1, keepdims=True)
        v = jnp.mean((t - m) ** 2, axis=-1, keepdims=True)
        return (t - m) * jax.lax.rsqrt(v + 1e-5) * g[0] + b[0]

    q = ln(x, p["g1"], p["b1"])
    k = ln(kv, p["g2"], p["b2"])
    Q = q @ p["wq"] + p["bq"][0]
    K = k @ p["wk"] + p["bk"][0]
    V = k @ p["wv"] + p["bv"][0]
    Qh = Q.reshape(B, Lq, heads, Dh).transpose(0, 2, 1, 3)
    Kh = K.reshape(B, Lkv, heads, Dh).transpose(0, 2, 1, 3)
    Vh = V.reshape(B, Lkv, heads, Dh).transpose(0, 2, 1, 3)
    s = jnp.einsum("bhqd,bhkd->bhqk", Qh, Kh) / math.sqrt(Dh)
    s = s + mask_bias[:, None, :, :]
    a = jax.nn.softmax(s, axis=-1)
    o = jnp.einsum("bhqk,bhkd->bhqd", a, Vh).transpose(0, 2, 1, 3).reshape(B, Lq, W)
    x1 = x + o @ p["wo"] + p["bo"][0]
    h = ln(x1, p["g3"], p["b3"])
    mlp = jax.nn.gelu(h @ p["wfc"] + p["bfc"][0], approximate=False) @ p["wpr"] + p["bpr"][0]
    return x1 + mlp


def cross_attention_blocks_ref(x, kv, layer_params, *, heads, key_padding_mask=None):
    B, _, _ = x.shape
    Lkv = kv.shape[1]
    if key_padding_mask is None:
        mask_bias = jnp.zeros((B, 1, Lkv), jnp.float32)
    else:
        mask_bias = jnp.where(key_padding_mask, -1e30, 0.0).astype(jnp.float32).reshape(B, 1, Lkv)
    for p in layer_params:
        x = _ref_layer(x, kv, p, heads, mask_bias)
    return x


# ----------------------------- deterministic param init -----------------------------

def init_layer_params(key, width):
    W = width
    ks = jax.random.split(key, 6)
    n = lambda k, shape: jax.random.normal(k, shape, jnp.float32) * 0.02

    in_proj_w = n(ks[0], (3 * W, W))      # nn.MultiheadAttention.in_proj_weight
    in_proj_b = n(ks[1], (3 * W,))
    out_w = n(ks[2], (W, W))              # attn.out_proj
    out_b = jnp.zeros((W,), jnp.float32)
    fc_w = n(ks[3], (4 * W, W))           # MLP.c_fc
    fc_b = n(ks[4], (4 * W,))
    pr_w = n(ks[5], (W, 4 * W))           # MLP.c_proj
    pr_b = jnp.zeros((W,), jnp.float32)

    ones = jnp.ones((1, W), jnp.float32)
    zeros = jnp.zeros((1, W), jnp.float32)
    return dict(
        g1=ones, b1=zeros, g2=ones, b2=zeros, g3=ones, b3=zeros,
        wq=in_proj_w[:W].T,        bq=in_proj_b[:W].reshape(1, W),
        wk=in_proj_w[W:2 * W].T,   bk=in_proj_b[W:2 * W].reshape(1, W),
        wv=in_proj_w[2 * W:].T,    bv=in_proj_b[2 * W:].reshape(1, W),
        wo=out_w.T,                bo=out_b.reshape(1, W),
        wfc=fc_w.T,                bfc=fc_b.reshape(1, 4 * W),
        wpr=pr_w.T,                bpr=pr_b.reshape(1, W),
    )


def init_params(key, width, layers):
    keys = jax.random.split(key, layers)
    return [init_layer_params(k, width) for k in keys]


# ----------------------------- demo -----------------------------

if __name__ == "__main__":
    B, Lq, Lkv, WIDTH, HEADS, LAYERS = 2, 8, 16, 32, 4, 2

    root = jax.random.PRNGKey(0)
    kx, kkv, kp = jax.random.split(root, 3)
    x = jax.random.normal(kx, (B, Lq, WIDTH), jnp.float32)
    kv = jax.random.normal(kkv, (B, Lkv, WIDTH), jnp.float32)
    params = init_params(kp, WIDTH, LAYERS)

    # key_padding_mask: True == ignore that key position (last 3 keys of batch element 1).
    key_padding_mask = jnp.zeros((B, Lkv), jnp.bool_).at[1, Lkv - 3:].set(True)

    out = cross_attention_blocks(x, kv, params, heads=HEADS,
                                 key_padding_mask=key_padding_mask)
    out = jax.block_until_ready(out)
    assert out.shape == (B, Lq, WIDTH) and out.dtype == jnp.float32

    ref = jax.block_until_ready(
        cross_attention_blocks_ref(x, kv, params, heads=HEADS,
                                   key_padding_mask=key_padding_mask))
    err = float(jnp.max(jnp.abs(out - ref)))
    assert err < 5e-2, f"max abs error vs reference too large: {err}"

    print("KERNEL_OK")
</pallas_src>

<mosaic_0001>
module attributes {stable_mosaic.version = 11 : i64} {
  func.func @_cross_block_stack_kernel(%arg0: i32, %arg1: i32, %arg2: memref<1x8x32xf32, #tpu.memory_space<vmem>>, %arg3: memref<1x16x32xf32, #tpu.memory_space<vmem>>, %arg4: memref<1x1x16xf32, #tpu.memory_space<vmem>>, %arg5: memref<1x1x32xf32, #tpu.memory_space<vmem>>, %arg6: memref<1x1x32xf32, #tpu.memory_space<vmem>>, %arg7: memref<1x1x32xf32, #tpu.memory_space<vmem>>, %arg8: memref<1x1x32xf32, #tpu.memory_space<vmem>>, %arg9: memref<1x32x32xbf16, #tpu.memory_space<vmem>>, %arg10: memref<1x1x32xf32, #tpu.memory_space<vmem>>, %arg11: memref<1x32x32xbf16, #tpu.memory_space<vmem>>, %arg12: memref<1x1x32xf32, #tpu.memory_space<vmem>>, %arg13: memref<1x32x32xbf16, #tpu.memory_space<vmem>>, %arg14: memref<1x1x32xf32, #tpu.memory_space<vmem>>, %arg15: memref<1x32x32xbf16, #tpu.memory_space<vmem>>, %arg16: memref<1x1x32xf32, #tpu.memory_space<vmem>>, %arg17: memref<1x1x32xf32, #tpu.memory_space<vmem>>, %arg18: memref<1x1x32xf32, #tpu.memory_space<vmem>>, %arg19: memref<1x32x128xbf16, #tpu.memory_space<vmem>>, %arg20: memref<1x1x128xf32, #tpu.memory_space<vmem>>, %arg21: memref<1x128x32xbf16, #tpu.memory_space<vmem>>, %arg22: memref<1x1x32xf32, #tpu.memory_space<vmem>>, %arg23: memref<1x8x32xf32, #tpu.memory_space<vmem>>, %arg24: memref<8x32xf32, #tpu.memory_space<vmem>>) attributes {dimension_semantics = [#tpu.dimension_semantics<parallel>, #tpu.dimension_semantics<arbitrary>], iteration_bounds = array<i64: 2, 2>, scalar_prefetch = 0 : i64, scratch_operands = 1 : i64, tpu.core_type = #tpu.core_type<tc>, window_params = [{transform_indices = @transform_0, window_bounds = array<i64: 1, 8, 32>}, {transform_indices = @transform_1, window_bounds = array<i64: 1, 16, 32>}, {transform_indices = @transform_2, window_bounds = array<i64: 1, 1, 16>}, {transform_indices = @transform_3, window_bounds = array<i64: 1, 1, 32>}, {transform_indices = @transform_4, window_bounds = array<i64: 1, 1, 32>}, {transform_indices = @transform_5, window_bounds = array<i64: 1, 1, 32>}, {transform_indices = @transform_6, window_bounds = array<i64: 1, 1, 32>}, {transform_indices = @transform_7, window_bounds = array<i64: 1, 32, 32>}, {transform_indices = @transform_8, window_bounds = array<i64: 1, 1, 32>}, {transform_indices = @transform_9, window_bounds = array<i64: 1, 32, 32>}, {transform_indices = @transform_10, window_bounds = array<i64: 1, 1, 32>}, {transform_indices = @transform_11, window_bounds = array<i64: 1, 32, 32>}, {transform_indices = @transform_12, window_bounds = array<i64: 1, 1, 32>}, {transform_indices = @transform_13, window_bounds = array<i64: 1, 32, 32>}, {transform_indices = @transform_14, window_bounds = array<i64: 1, 1, 32>}, {transform_indices = @transform_15, window_bounds = array<i64: 1, 1, 32>}, {transform_indices = @transform_16, window_bounds = array<i64: 1, 1, 32>}, {transform_indices = @transform_17, window_bounds = array<i64: 1, 32, 128>}, {transform_indices = @transform_18, window_bounds = array<i64: 1, 1, 128>}, {transform_indices = @transform_19, window_bounds = array<i64: 1, 128, 32>}, {transform_indices = @transform_20, window_bounds = array<i64: 1, 1, 32>}, {transform_indices = @transform_21, window_bounds = array<i64: 1, 8, 32>}]} {
    %c0_i32 = arith.constant 0 : i32
    %0 = arith.cmpi eq, %arg1, %c0_i32 : i32
    %1 = arith.extui %0 : i1 to i32
    %c0_i32_0 = arith.constant 0 : i32
    %2 = arith.cmpi ne, %1, %c0_i32_0 : i32
    scf.if %2 {
      %c0_92 = arith.constant 0 : index
      %c0_93 = arith.constant 0 : index
      %c0_94 = arith.constant 0 : index
      %184 = vector.load %arg2[%c0_92, %c0_93, %c0_94] : memref<1x8x32xf32, #tpu.memory_space<vmem>>, vector<1x8x32xf32>
      %185 = vector.shape_cast %184 : vector<1x8x32xf32> to vector<8x32xf32>
      %c0_95 = arith.constant 0 : index
      %c0_96 = arith.constant 0 : index
      %186 = vector.load %arg24[%c0_95, %c0_96] : memref<8x32xf32, #tpu.memory_space<vmem>>, vector<8x32xf32>
      tpu.vector_store %arg24[%c0_95, %c0_96], %185 {strides = array<i32>} : memref<8x32xf32, #tpu.memory_space<vmem>>, vector<8x32xf32>,
    } else {
    }
    %c0 = arith.constant 0 : index
    %c0_1 = arith.constant 0 : index
    %3 = vector.load %arg24[%c0, %c0_1] : memref<8x32xf32, #tpu.memory_space<vmem>>, vector<8x32xf32>
    %c0_2 = arith.constant 0 : index
    %c0_3 = arith.constant 0 : index
    %c0_4 = arith.constant 0 : index
    %4 = vector.load %arg3[%c0_2, %c0_3, %c0_4] : memref<1x16x32xf32, #tpu.memory_space<vmem>>, vector<1x16x32xf32>
    %5 = vector.shape_cast %4 : vector<1x16x32xf32> to vector<16x32xf32>
    %c0_5 = arith.constant 0 : index
    %c0_6 = arith.constant 0 : index
    %c0_7 = arith.constant 0 : index
    %6 = vector.load %arg4[%c0_5, %c0_6, %c0_7] : memref<1x1x16xf32, #tpu.memory_space<vmem>>, vector<1x1x16xf32>
    %c0_8 = arith.constant 0 : index
    %c0_9 = arith.constant 0 : index
    %c0_10 = arith.constant 0 : index
    %7 = vector.load %arg5[%c0_8, %c0_9, %c0_10] : memref<1x1x32xf32, #tpu.memory_space<vmem>>, vector<1x1x32xf32>
    %8 = vector.shape_cast %7 : vector<1x1x32xf32> to vector<1x32xf32>
    %c0_11 = arith.constant 0 : index
    %c0_12 = arith.constant 0 : index
    %c0_13 = arith.constant 0 : index
    %9 = vector.load %arg6[%c0_11, %c0_12, %c0_13] : memref<1x1x32xf32, #tpu.memory_space<vmem>>, vector<1x1x32xf32>
    %10 = vector.shape_cast %9 : vector<1x1x32xf32> to vector<1x32xf32>
    %cst = arith.constant dense<0.000000e+00> : vector<8xf32>
    %11 = vector.multi_reduction <add>, %3, %cst [1] : vector<8x32xf32> to vector<8xf32>
    %12 = vector.shape_cast %11 : vector<8xf32> to vector<8x1xf32>
    %cst_14 = arith.constant 3.200000e+01 : f32
    %13 = vector.broadcast %cst_14 : f32 to vector<8x1xf32>
    %14 = arith.divf %12, %13 : vector<8x1xf32>
    %15 = vector.broadcast %14 : vector<8x1xf32> to vector<8x32xf32>
    %16 = arith.subf %3, %15 : vector<8x32xf32>
    %17 = arith.mulf %16, %16 : vector<8x32xf32>
    %cst_15 = arith.constant dense<0.000000e+00> : vector<8xf32>
    %18 = vector.multi_reduction <add>, %17, %cst_15 [1] : vector<8x32xf32> to vector<8xf32>
    %19 = vector.shape_cast %18 : vector<8xf32> to vector<8x1xf32>
    %cst_16 = arith.constant 3.200000e+01 : f32
    %20 = vector.broadcast %cst_16 : f32 to vector<8x1xf32>
    %21 = arith.divf %19, %20 : vector<8x1xf32>
    %cst_17 = arith.constant 9.99999974E-6 : f32
    %22 = vector.broadcast %cst_17 : f32 to vector<8x1xf32>
    %23 = arith.addf %21, %22 : vector<8x1xf32>
    %24 = math.rsqrt %23 : vector<8x1xf32>
    %25 = vector.broadcast %24 : vector<8x1xf32> to vector<8x32xf32>
    %26 = arith.mulf %16, %25 : vector<8x32xf32>
    %27 = vector.broadcast %8 : vector<1x32xf32> to vector<8x32xf32>
    %28 = arith.mulf %26, %27 : vector<8x32xf32>
    %29 = vector.broadcast %10 : vector<1x32xf32> to vector<8x32xf32>
    %30 = arith.addf %28, %29 : vector<8x32xf32>
    %c0_18 = arith.constant 0 : index
    %c0_19 = arith.constant 0 : index
    %c0_20 = arith.constant 0 : index
    %31 = vector.load %arg7[%c0_18, %c0_19, %c0_20] : memref<1x1x32xf32, #tpu.memory_space<vmem>>, vector<1x1x32xf32>
    %32 = vector.shape_cast %31 : vector<1x1x32xf32> to vector<1x32xf32>
    %c0_21 = arith.constant 0 : index
    %c0_22 = arith.constant 0 : index
    %c0_23 = arith.constant 0 : index
    %33 = vector.load %arg8[%c0_21, %c0_22, %c0_23] : memref<1x1x32xf32, #tpu.memory_space<vmem>>, vector<1x1x32xf32>
    %34 = vector.shape_cast %33 : vector<1x1x32xf32> to vector<1x32xf32>
    %cst_24 = arith.constant dense<0.000000e+00> : vector<16xf32>
    %35 = vector.multi_reduction <add>, %5, %cst_24 [1] : vector<16x32xf32> to vector<16xf32>
    %36 = vector.shape_cast %35 : vector<16xf32> to vector<16x1xf32>
    %cst_25 = arith.constant 3.200000e+01 : f32
    %37 = vector.broadcast %cst_25 : f32 to vector<16x1xf32>
    %38 = arith.divf %36, %37 : vector<16x1xf32>
    %39 = vector.broadcast %38 : vector<16x1xf32> to vector<16x32xf32>
    %40 = arith.subf %5, %39 : vector<16x32xf32>
    %41 = arith.mulf %40, %40 : vector<16x32xf32>
    %cst_26 = arith.constant dense<0.000000e+00> : vector<16xf32>
    %42 = vector.multi_reduction <add>, %41, %cst_26 [1] : vector<16x32xf32> to vector<16xf32>
    %43 = vector.shape_cast %42 : vector<16xf32> to vector<16x1xf32>
    %cst_27 = arith.constant 3.200000e+01 : f32
    %44 = vector.broadcast %cst_27 : f32 to vector<16x1xf32>
    %45 = arith.divf %43, %44 : vector<16x1xf32>
    %cst_28 = arith.constant 9.99999974E-6 : f32
    %46 = vector.broadcast %cst_28 : f32 to vector<16x1xf32>
    %47 = arith.addf %45, %46 : vector<16x1xf32>
    %48 = math.rsqrt %47 : vector<16x1xf32>
    %49 = vector.broadcast %48 : vector<16x1xf32> to vector<16x32xf32>
    %50 = arith.mulf %40, %49 : vector<16x32xf32>
    %51 = vector.broadcast %32 : vector<1x32xf32> to vector<16x32xf32>
    %52 = arith.mulf %50, %51 : vector<16x32xf32>
    %53 = vector.broadcast %34 : vector<1x32xf32> to vector<16x32xf32>
    %54 = arith.addf %52, %53 : vector<16x32xf32>
    %55 = arith.truncf %30 : vector<8x32xf32> to vector<8x32xbf16>
    %c0_29 = arith.constant 0 : index
    %c0_30 = arith.constant 0 : index
    %c0_31 = arith.constant 0 : index
    %56 = vector.load %arg9[%c0_29, %c0_30, %c0_31] : memref<1x32x32xbf16, #tpu.memory_space<vmem>>, vector<1x32x32xbf16>
    %57 = vector.shape_cast %56 : vector<1x32x32xbf16> to vector<32x32xbf16>
    %cst_32 = arith.constant dense<0.000000e+00> : vector<8x32xf32>
    %58 = tpu.matmul %55, %57, %cst_32 {dimension_numbers = #tpu.dot_dimension_numbers<[1], [0], [0], [1], [0, 0, 1, 1], [], []>} : vector<8x32xbf16>, vector<32x32xbf16>, vector<8x32xf32> -> vector<8x32xf32>
    %c0_33 = arith.constant 0 : index
    %c0_34 = arith.constant 0 : index
    %c0_35 = arith.constant 0 : index
    %59 = vector.load %arg10[%c0_33, %c0_34, %c0_35] : memref<1x1x32xf32, #tpu.memory_space<vmem>>, vector<1x1x32xf32>
    %60 = vector.shape_cast %59 : vector<1x1x32xf32> to vector<1x32xf32>
    %61 = vector.broadcast %60 : vector<1x32xf32> to vector<8x32xf32>
    %62 = arith.addf %58, %61 : vector<8x32xf32>
    %63 = arith.truncf %54 : vector<16x32xf32> to vector<16x32xbf16>
    %c0_36 = arith.constant 0 : index
    %c0_37 = arith.constant 0 : index
    %c0_38 = arith.constant 0 : index
    %64 = vector.load %arg11[%c0_36, %c0_37, %c0_38] : memref<1x32x32xbf16, #tpu.memory_space<vmem>>, vector<1x32x32xbf16>
    %65 = vector.shape_cast %64 : vector<1x32x32xbf16> to vector<32x32xbf16>
    %cst_39 = arith.constant dense<0.000000e+00> : vector<16x32xf32>
    %66 = tpu.matmul %63, %65, %cst_39 {dimension_numbers = #tpu.dot_dimension_numbers<[1], [0], [0], [1], [0, 0, 1, 1], [], []>} : vector<16x32xbf16>, vector<32x32xbf16>, vector<16x32xf32> -> vector<16x32xf32>
    %c0_40 = arith.constant 0 : index
    %c0_41 = arith.constant 0 : index
    %c0_42 = arith.constant 0 : index
    %67 = vector.load %arg12[%c0_40, %c0_41, %c0_42] : memref<1x1x32xf32, #tpu.memory_space<vmem>>, vector<1x1x32xf32>
    %68 = vector.shape_cast %67 : vector<1x1x32xf32> to vector<1x32xf32>
    %69 = vector.broadcast %68 : vector<1x32xf32> to vector<16x32xf32>
    %70 = arith.addf %66, %69 : vector<16x32xf32>
    %71 = arith.truncf %54 : vector<16x32xf32> to vector<16x32xbf16>
    %c0_43 = arith.constant 0 : index
    %c0_44 = arith.constant 0 : index
    %c0_45 = arith.constant 0 : index
    %72 = vector.load %arg13[%c0_43, %c0_44, %c0_45] : memref<1x32x32xbf16, #tpu.memory_space<vmem>>, vector<1x32x32xbf16>
    %73 = vector.shape_cast %72 : vector<1x32x32xbf16> to vector<32x32xbf16>
    %cst_46 = arith.constant dense<0.000000e+00> : vector<16x32xf32>
    %74 = tpu.matmul %71, %73, %cst_46 {dimension_numbers = #tpu.dot_dimension_numbers<[1], [0], [0], [1], [0, 0, 1, 1], [], []>} : vector<16x32xbf16>, vector<32x32xbf16>, vector<16x32xf32> -> vector<16x32xf32>
    %c0_47 = arith.constant 0 : index
    %c0_48 = arith.constant 0 : index
    %c0_49 = arith.constant 0 : index
    %75 = vector.load %arg14[%c0_47, %c0_48, %c0_49] : memref<1x1x32xf32, #tpu.memory_space<vmem>>, vector<1x1x32xf32>
    %76 = vector.shape_cast %75 : vector<1x1x32xf32> to vector<1x32xf32>
    %77 = vector.broadcast %76 : vector<1x32xf32> to vector<16x32xf32>
    %78 = arith.addf %74, %77 : vector<16x32xf32>
    %79 = vector.shape_cast %62 : vector<8x32xf32> to vector<1x8x32xf32>
    %80 = vector.extract_strided_slice %79 {offsets = [0, 0, 0], sizes = [1, 8, 8], strides = [1, 1, 1]} : vector<1x8x32xf32> to vector<1x8x8xf32>
    %81 = vector.extract_strided_slice %79 {offsets = [0, 0, 8], sizes = [1, 8, 8], strides = [1, 1, 1]} : vector<1x8x32xf32> to vector<1x8x8xf32>
    %82 = vector.extract_strided_slice %79 {offsets = [0, 0, 16], sizes = [1, 8, 8], strides = [1, 1, 1]} : vector<1x8x32xf32> to vector<1x8x8xf32>
    %83 = vector.extract_strided_slice %79 {offsets = [0, 0, 24], sizes = [1, 8, 8], strides = [1, 1, 1]} : vector<1x8x32xf32> to vector<1x8x8xf32>
    %84 = tpu.concatenate %80, %81, %82, %83 in 0 : vector<1x8x8xf32>, vector<1x8x8xf32>, vector<1x8x8xf32>, vector<1x8x8xf32> -> vector<4x8x8xf32>
    %85 = arith.truncf %84 : vector<4x8x8xf32> to vector<4x8x8xbf16>
    %86 = vector.shape_cast %70 : vector<16x32xf32> to vector<1x16x32xf32>
    %87 = vector.extract_strided_slice %86 {offsets = [0, 0, 0], sizes = [1, 16, 8], strides = [1, 1, 1]} : vector<1x16x32xf32> to vector<1x16x8xf32>
    %88 = vector.extract_strided_slice %86 {offsets = [0, 0, 8], sizes = [1, 16, 8], strides = [1, 1, 1]} : vector<1x16x32xf32> to vector<1x16x8xf32>
    %89 = vector.extract_strided_slice %86 {offsets = [0, 0, 16], sizes = [1, 16, 8], strides = [1, 1, 1]} : vector<1x16x32xf32> to vector<1x16x8xf32>
    %90 = vector.extract_strided_slice %86 {offsets = [0, 0, 24], sizes = [1, 16, 8], strides = [1, 1, 1]} : vector<1x16x32xf32> to vector<1x16x8xf32>
    %91 = tpu.concatenate %87, %88, %89, %90 in 0 : vector<1x16x8xf32>, vector<1x16x8xf32>, vector<1x16x8xf32>, vector<1x16x8xf32> -> vector<4x16x8xf32>
    %92 = arith.truncf %91 : vector<4x16x8xf32> to vector<4x16x8xbf16>
    %93 = vector.shape_cast %78 : vector<16x32xf32> to vector<1x16x32xf32>
    %94 = vector.extract_strided_slice %93 {offsets = [0, 0, 0], sizes = [1, 16, 8], strides = [1, 1, 1]} : vector<1x16x32xf32> to vector<1x16x8xf32>
    %95 = vector.extract_strided_slice %93 {offsets = [0, 0, 8], sizes = [1, 16, 8], strides = [1, 1, 1]} : vector<1x16x32xf32> to vector<1x16x8xf32>
    %96 = vector.extract_strided_slice %93 {offsets = [0, 0, 16], sizes = [1, 16, 8], strides = [1, 1, 1]} : vector<1x16x32xf32> to vector<1x16x8xf32>
    %97 = vector.extract_strided_slice %93 {offsets = [0, 0, 24], sizes = [1, 16, 8], strides = [1, 1, 1]} : vector<1x16x32xf32> to vector<1x16x8xf32>
    %98 = tpu.concatenate %94, %95, %96, %97 in 0 : vector<1x16x8xf32>, vector<1x16x8xf32>, vector<1x16x8xf32>, vector<1x16x8xf32> -> vector<4x16x8xf32>
    %99 = arith.truncf %98 : vector<4x16x8xf32> to vector<4x16x8xbf16>
    "tpu.trace_start"() <{level = 10 : i32, message = "zqd,zkd->zqk"}> : () -> ()
    %cst_50 = arith.constant dense<0.000000e+00> : vector<4x8x16xf32>
    %100 = tpu.matmul %85, %92, %cst_50 {dimension_numbers = #tpu.dot_dimension_numbers<[2], [2], [1], [1], [0, 0, 0, 1, 1, 1], [0], [0]>} : vector<4x8x8xbf16>, vector<4x16x8xbf16>, vector<4x8x16xf32> -> vector<4x8x16xf32>
    "tpu.trace_stop"() : () -> ()
    %101 = tpu.concatenate %6, %6, %6, %6 in 0 : vector<1x1x16xf32>, vector<1x1x16xf32>, vector<1x1x16xf32>, vector<1x1x16xf32> -> vector<4x1x16xf32>
    %102 = vector.broadcast %101 : vector<4x1x16xf32> to vector<4x8x16xf32>
    %103 = arith.addf %100, %102 : vector<4x8x16xf32>
    %cst_51 = arith.constant dense<0xFF800000> : vector<4x8xf32>
    %104 = vector.multi_reduction <maximumf>, %103, %cst_51 [2] : vector<4x8x16xf32> to vector<4x8xf32>
    %105 = vector.shape_cast %104 : vector<4x8xf32> to vector<4x8x1xf32>
    %106 = vector.broadcast %105 : vector<4x8x1xf32> to vector<4x8x16xf32>
    %107 = arith.subf %103, %106 : vector<4x8x16xf32>
    %108 = math.exp %107 : vector<4x8x16xf32>
    %cst_52 = arith.constant dense<0.000000e+00> : vector<4x8xf32>
    %109 = vector.multi_reduction <add>, %108, %cst_52 [2] : vector<4x8x16xf32> to vector<4x8xf32>
    %110 = vector.shape_cast %109 : vector<4x8xf32> to vector<4x8x1xf32>
    %111 = tpu.reciprocal %110 {approx = true} : vector<4x8x1xf32> -> vector<4x8x1xf32>
    %112 = vector.broadcast %111 : vector<4x8x1xf32> to vector<4x8x16xf32>
    %113 = arith.mulf %108, %112 : vector<4x8x16xf32>
    %114 = arith.truncf %113 : vector<4x8x16xf32> to vector<4x8x16xbf16>
    "tpu.trace_start"() <{level = 10 : i32, message = "zqk,zkd->zqd"}> : () -> ()
    %cst_53 = arith.constant dense<0.000000e+00> : vector<4x8x8xf32>
    %115 = tpu.matmul %114, %99, %cst_53 {dimension_numbers = #tpu.dot_dimension_numbers<[2], [1], [1], [2], [0, 0, 0, 1, 1, 2], [0], [0]>} : vector<4x8x16xbf16>, vector<4x16x8xbf16>, vector<4x8x8xf32> -> vector<4x8x8xf32>
    "tpu.trace_stop"() : () -> ()
    %116 = vector.extract_strided_slice %115 {offsets = [0, 0, 0], sizes = [1, 8, 8], strides = [1, 1, 1]} : vector<4x8x8xf32> to vector<1x8x8xf32>
    %117 = vector.extract_strided_slice %115 {offsets = [1, 0, 0], sizes = [1, 8, 8], strides = [1, 1, 1]} : vector<4x8x8xf32> to vector<1x8x8xf32>
    %118 = vector.extract_strided_slice %115 {offsets = [2, 0, 0], sizes = [1, 8, 8], strides = [1, 1, 1]} : vector<4x8x8xf32> to vector<1x8x8xf32>
    %119 = vector.extract_strided_slice %115 {offsets = [3, 0, 0], sizes = [1, 8, 8], strides = [1, 1, 1]} : vector<4x8x8xf32> to vector<1x8x8xf32>
    %120 = tpu.concatenate %116, %117, %118, %119 in 2 : vector<1x8x8xf32>, vector<1x8x8xf32>, vector<1x8x8xf32>, vector<1x8x8xf32> -> vector<1x8x32xf32>
    %121 = vector.shape_cast %120 : vector<1x8x32xf32> to vector<8x32xf32>
    %122 = arith.truncf %121 : vector<8x32xf32> to vector<8x32xbf16>
    %c0_54 = arith.constant 0 : index
    %c0_55 = arith.constant 0 : index
    %c0_56 = arith.constant 0 : index
    %123 = vector.load %arg15[%c0_54, %c0_55, %c0_56] : memref<1x32x32xbf16, #tpu.memory_space<vmem>>, vector<1x32x32xbf16>
    %124 = vector.shape_cast %123 : vector<1x32x32xbf16> to vector<32x32xbf16>
    %cst_57 = arith.constant dense<0.000000e+00> : vector<8x32xf32>
    %125 = tpu.matmul %122, %124, %cst_57 {dimension_numbers = #tpu.dot_dimension_numbers<[1], [0], [0], [1], [0, 0, 1, 1], [], []>} : vector<8x32xbf16>, vector<32x32xbf16>, vector<8x32xf32> -> vector<8x32xf32>
    %c0_58 = arith.constant 0 : index
    %c0_59 = arith.constant 0 : index
    %c0_60 = arith.constant 0 : index
    %126 = vector.load %arg16[%c0_58, %c0_59, %c0_60] : memref<1x1x32xf32, #tpu.memory_space<vmem>>, vector<1x1x32xf32>
    %127 = vector.shape_cast %126 : vector<1x1x32xf32> to vector<1x32xf32>
    %128 = vector.broadcast %127 : vector<1x32xf32> to vector<8x32xf32>
    %129 = arith.addf %125, %128 : vector<8x32xf32>
    %130 = arith.addf %3, %129 : vector<8x32xf32>
    %c0_61 = arith.constant 0 : index
    %c0_62 = arith.constant 0 : index
    %c0_63 = arith.constant 0 : index
    %131 = vector.load %arg17[%c0_61, %c0_62, %c0_63] : memref<1x1x32xf32, #tpu.memory_space<vmem>>, vector<1x1x32xf32>
    %132 = vector.shape_cast %131 : vector<1x1x32xf32> to vector<1x32xf32>
    %c0_64 = arith.constant 0 : index
    %c0_65 = arith.constant 0 : index
    %c0_66 = arith.constant 0 : index
    %133 = vector.load %arg18[%c0_64, %c0_65, %c0_66] : memref<1x1x32xf32, #tpu.memory_space<vmem>>, vector<1x1x32xf32>
    %134 = vector.shape_cast %133 : vector<1x1x32xf32> to vector<1x32xf32>
    %cst_67 = arith.constant dense<0.000000e+00> : vector<8xf32>
    %135 = vector.multi_reduction <add>, %130, %cst_67 [1] : vector<8x32xf32> to vector<8xf32>
    %136 = vector.shape_cast %135 : vector<8xf32> to vector<8x1xf32>
    %cst_68 = arith.constant 3.200000e+01 : f32
    %137 = vector.broadcast %cst_68 : f32 to vector<8x1xf32>
    %138 = arith.divf %136, %137 : vector<8x1xf32>
    %139 = vector.broadcast %138 : vector<8x1xf32> to vector<8x32xf32>
    %140 = arith.subf %130, %139 : vector<8x32xf32>
    %141 = arith.mulf %140, %140 : vector<8x32xf32>
    %cst_69 = arith.constant dense<0.000000e+00> : vector<8xf32>
    %142 = vector.multi_reduction <add>, %141, %cst_69 [1] : vector<8x32xf32> to vector<8xf32>
    %143 = vector.shape_cast %142 : vector<8xf32> to vector<8x1xf32>
    %cst_70 = arith.constant 3.200000e+01 : f32
    %144 = vector.broadcast %cst_70 : f32 to vector<8x1xf32>
    %145 = arith.divf %143, %144 : vector<8x1xf32>
    %cst_71 = arith.constant 9.99999974E-6 : f32
    %146 = vector.broadcast %cst_71 : f32 to vector<8x1xf32>
    %147 = arith.addf %145, %146 : vector<8x1xf32>
    %148 = math.rsqrt %147 : vector<8x1xf32>
    %149 = vector.broadcast %148 : vector<8x1xf32> to vector<8x32xf32>
    %150 = arith.mulf %140, %149 : vector<8x32xf32>
    %151 = vector.broadcast %132 : vector<1x32xf32> to vector<8x32xf32>
    %152 = arith.mulf %150, %151 : vector<8x32xf32>
    %153 = vector.broadcast %134 : vector<1x32xf32> to vector<8x32xf32>
    %154 = arith.addf %152, %153 : vector<8x32xf32>
    %155 = arith.truncf %154 : vector<8x32xf32> to vector<8x32xbf16>
    %c0_72 = arith.constant 0 : index
    %c0_73 = arith.constant 0 : index
    %c0_74 = arith.constant 0 : index
    %156 = vector.load %arg19[%c0_72, %c0_73, %c0_74] : memref<1x32x128xbf16, #tpu.memory_space<vmem>>, vector<1x32x128xbf16>
    %157 = vector.shape_cast %156 : vector<1x32x128xbf16> to vector<32x128xbf16>
    %cst_75 = arith.constant dense<0.000000e+00> : vector<8x128xf32>
    %158 = tpu.matmul %155, %157, %cst_75 {dimension_numbers = #tpu.dot_dimension_numbers<[1], [0], [0], [1], [0, 0, 1, 1], [], []>} : vector<8x32xbf16>, vector<32x128xbf16>, vector<8x128xf32> -> vector<8x128xf32>
    %c0_76 = arith.constant 0 : index
    %c0_77 = arith.constant 0 : index
    %c0_78 = arith.constant 0 : index
    %159 = vector.load %arg20[%c0_76, %c0_77, %c0_78] : memref<1x1x128xf32, #tpu.memory_space<vmem>>, vector<1x1x128xf32>
    %160 = vector.shape_cast %159 : vector<1x1x128xf32> to vector<1x128xf32>
    %161 = vector.broadcast %160 : vector<1x128xf32> to vector<8x128xf32>
    %162 = arith.addf %158, %161 : vector<8x128xf32>
    %cst_79 = arith.constant 5.000000e-01 : f32
    %163 = vector.broadcast %cst_79 : f32 to vector<8x128xf32>
    %164 = arith.mulf %163, %162 : vector<8x128xf32>
    %cst_80 = arith.constant 0.707106769 : f32
    %165 = vector.broadcast %cst_80 : f32 to vector<8x128xf32>
    %166 = arith.mulf %162, %165 : vector<8x128xf32>
    %167 = math.erf %166 : vector<8x128xf32>
    %cst_81 = arith.constant 1.000000e+00 : f32
    %168 = vector.broadcast %cst_81 : f32 to vector<8x128xf32>
    %169 = arith.addf %168, %167 : vector<8x128xf32>
    %170 = arith.mulf %164, %169 : vector<8x128xf32>
    %171 = arith.truncf %170 : vector<8x128xf32> to vector<8x128xbf16>
    %c0_82 = arith.constant 0 : index
    %c0_83 = arith.constant 0 : index
    %c0_84 = arith.constant 0 : index
    %172 = vector.load %arg21[%c0_82, %c0_83, %c0_84] : memref<1x128x32xbf16, #tpu.memory_space<vmem>>, vector<1x128x32xbf16>
    %173 = vector.shape_cast %172 : vector<1x128x32xbf16> to vector<128x32xbf16>
    %cst_85 = arith.constant dense<0.000000e+00> : vector<8x32xf32>
    %174 = tpu.matmul %171, %173, %cst_85 {dimension_numbers = #tpu.dot_dimension_numbers<[1], [0], [0], [1], [0, 0, 1, 1], [], []>} : vector<8x128xbf16>, vector<128x32xbf16>, vector<8x32xf32> -> vector<8x32xf32>
    %c0_86 = arith.constant 0 : index
    %c0_87 = arith.constant 0 : index
    %c0_88 = arith.constant 0 : index
    %175 = vector.load %arg22[%c0_86, %c0_87, %c0_88] : memref<1x1x32xf32, #tpu.memory_space<vmem>>, vector<1x1x32xf32>
    %176 = vector.shape_cast %175 : vector<1x1x32xf32> to vector<1x32xf32>
    %177 = vector.broadcast %176 : vector<1x32xf32> to vector<8x32xf32>
    %178 = arith.addf %174, %177 : vector<8x32xf32>
    %179 = arith.addf %130, %178 : vector<8x32xf32>
    %c0_89 = arith.constant 0 : index
    %c0_90 = arith.constant 0 : index
    %180 = vector.load %arg24[%c0_89, %c0_90] : memref<8x32xf32, #tpu.memory_space<vmem>>, vector<8x32xf32>
    tpu.vector_store %arg24[%c0_89, %c0_90], %179 {strides = array<i32>} : memref<8x32xf32, #tpu.memory_space<vmem>>, vector<8x32xf32>,
    %c1_i32 = arith.constant 1 : i32
    %181 = arith.cmpi eq, %arg1, %c1_i32 : i32
    %182 = arith.extui %181 : i1 to i32
    %c0_i32_91 = arith.constant 0 : i32
    %183 = arith.cmpi ne, %182, %c0_i32_91 : i32
    scf.if %183 {
      %184 = vector.shape_cast %179 : vector<8x32xf32> to vector<1x8x32xf32>
      %c0_92 = arith.constant 0 : index
      %c0_93 = arith.constant 0 : index
      %c0_94 = arith.constant 0 : index
      %185 = vector.load %arg23[%c0_92, %c0_93, %c0_94] : memref<1x8x32xf32, #tpu.memory_space<vmem>>, vector<1x8x32xf32>
      tpu.vector_store %arg23[%c0_92, %c0_93, %c0_94], %184 {strides = array<i32>} : memref<1x8x32xf32, #tpu.memory_space<vmem>>, vector<1x8x32xf32>,
    } else {
    }
    return
  }
  func.func @transform_0(%arg0: i32, %arg1: i32) -> (i32, i32, i32) {
    %c0_i32 = arith.constant 0 : i32
    %c0_i32_0 = arith.constant 0 : i32
    %c0_i32_1 = arith.constant 0 : i32
    return %arg0, %c0_i32, %c0_i32_0 : i32, i32, i32
  }
  func.func @transform_1(%arg0: i32, %arg1: i32) -> (i32, i32, i32) {
    %c0_i32 = arith.constant 0 : i32
    %c0_i32_0 = arith.constant 0 : i32
    %c0_i32_1 = arith.constant 0 : i32
    return %arg0, %c0_i32, %c0_i32_0 : i32, i32, i32
  }
  func.func @transform_2(%arg0: i32, %arg1: i32) -> (i32, i32, i32) {
    %c0_i32 = arith.constant 0 : i32
    %c0_i32_0 = arith.constant 0 : i32
    %c0_i32_1 = arith.constant 0 : i32
    return %arg0, %c0_i32, %c0_i32_0 : i32, i32, i32
  }
  func.func @transform_3(%arg0: i32, %arg1: i32) -> (i32, i32, i32) {
    %c0_i32 = arith.constant 0 : i32
    %c0_i32_0 = arith.constant 0 : i32
    %c0_i32_1 = arith.constant 0 : i32
    return %arg1, %c0_i32, %c0_i32_0 : i32, i32, i32
  }
  func.func @transform_4(%arg0: i32, %arg1: i32) -> (i32, i32, i32) {
    %c0_i32 = arith.constant 0 : i32
    %c0_i32_0 = arith.constant 0 : i32
    %c0_i32_1 = arith.constant 0 : i32
    return %arg1, %c0_i32, %c0_i32_0 : i32, i32, i32
  }
  func.func @transform_5(%arg0: i32, %arg1: i32) -> (i32, i32, i32) {
    %c0_i32 = arith.constant 0 : i32
    %c0_i32_0 = arith.constant 0 : i32
    %c0_i32_1 = arith.constant 0 : i32
    return %arg1, %c0_i32, %c0_i32_0 : i32, i32, i32
  }
  func.func @transform_6(%arg0: i32, %arg1: i32) -> (i32, i32, i32) {
    %c0_i32 = arith.constant 0 : i32
    %c0_i32_0 = arith.constant 0 : i32
    %c0_i32_1 = arith.constant 0 : i32
    return %arg1, %c0_i32, %c0_i32_0 : i32, i32, i32
  }
  func.func @transform_7(%arg0: i32, %arg1: i32) -> (i32, i32, i32) {
    %c0_i32 = arith.constant 0 : i32
    %c0_i32_0 = arith.constant 0 : i32
    %c0_i32_1 = arith.constant 0 : i32
    return %arg1, %c0_i32, %c0_i32_0 : i32, i32, i32
  }
  func.func @transform_8(%arg0: i32, %arg1: i32) -> (i32, i32, i32) {
    %c0_i32 = arith.constant 0 : i32
    %c0_i32_0 = arith.constant 0 : i32
    %c0_i32_1 = arith.constant 0 : i32
    return %arg1, %c0_i32, %c0_i32_0 : i32, i32, i32
  }
  func.func @transform_9(%arg0: i32, %arg1: i32) -> (i32, i32, i32) {
    %c0_i32 = arith.constant 0 : i32
    %c0_i32_0 = arith.constant 0 : i32
    %c0_i32_1 = arith.constant 0 : i32
    return %arg1, %c0_i32, %c0_i32_0 : i32, i32, i32
  }
  func.func @transform_10(%arg0: i32, %arg1: i32) -> (i32, i32, i32) {
    %c0_i32 = arith.constant 0 : i32
    %c0_i32_0 = arith.constant 0 : i32
    %c0_i32_1 = arith.constant 0 : i32
    return %arg1, %c0_i32, %c0_i32_0 : i32, i32, i32
  }
  func.func @transform_11(%arg0: i32, %arg1: i32) -> (i32, i32, i32) {
    %c0_i32 = arith.constant 0 : i32
    %c0_i32_0 = arith.constant 0 : i32
    %c0_i32_1 = arith.constant 0 : i32
    return %arg1, %c0_i32, %c0_i32_0 : i32, i32, i32
  }
  func.func @transform_12(%arg0: i32, %arg1: i32) -> (i32, i32, i32) {
    %c0_i32 = arith.constant 0 : i32
    %c0_i32_0 = arith.constant 0 : i32
    %c0_i32_1 = arith.constant 0 : i32
    return %arg1, %c0_i32, %c0_i32_0 : i32, i32, i32
  }
  func.func @transform_13(%arg0: i32, %arg1: i32) -> (i32, i32, i32) {
    %c0_i32 = arith.constant 0 : i32
    %c0_i32_0 = arith.constant 0 : i32
    %c0_i32_1 = arith.constant 0 : i32
    return %arg1, %c0_i32, %c0_i32_0 : i32, i32, i32
  }
  func.func @transform_14(%arg0: i32, %arg1: i32) -> (i32, i32, i32) {
    %c0_i32 = arith.constant 0 : i32
    %c0_i32_0 = arith.constant 0 : i32
    %c0_i32_1 = arith.constant 0 : i32
    return %arg1, %c0_i32, %c0_i32_0 : i32, i32, i32
  }
  func.func @transform_15(%arg0: i32, %arg1: i32) -> (i32, i32, i32) {
    %c0_i32 = arith.constant 0 : i32
    %c0_i32_0 = arith.constant 0 : i32
    %c0_i32_1 = arith.constant 0 : i32
    return %arg1, %c0_i32, %c0_i32_0 : i32, i32, i32
  }
  func.func @transform_16(%arg0: i32, %arg1: i32) -> (i32, i32, i32) {
    %c0_i32 = arith.constant 0 : i32
    %c0_i32_0 = arith.constant 0 : i32
    %c0_i32_1 = arith.constant 0 : i32
    return %arg1, %c0_i32, %c0_i32_0 : i32, i32, i32
  }
  func.func @transform_17(%arg0: i32, %arg1: i32) -> (i32, i32, i32) {
    %c0_i32 = arith.constant 0 : i32
    %c0_i32_0 = arith.constant 0 : i32
    %c0_i32_1 = arith.constant 0 : i32
    return %arg1, %c0_i32, %c0_i32_0 : i32, i32, i32
  }
  func.func @transform_18(%arg0: i32, %arg1: i32) -> (i32, i32, i32) {
    %c0_i32 = arith.constant 0 : i32
    %c0_i32_0 = arith.constant 0 : i32
    %c0_i32_1 = arith.constant 0 : i32
    return %arg1, %c0_i32, %c0_i32_0 : i32, i32, i32
  }
  func.func @transform_19(%arg0: i32, %arg1: i32) -> (i32, i32, i32) {
    %c0_i32 = arith.constant 0 : i32
    %c0_i32_0 = arith.constant 0 : i32
    %c0_i32_1 = arith.constant 0 : i32
    return %arg1, %c0_i32, %c0_i32_0 : i32, i32, i32
  }
  func.func @transform_20(%arg0: i32, %arg1: i32) -> (i32, i32, i32) {
    %c0_i32 = arith.constant 0 : i32
    %c0_i32_0 = arith.constant 0 : i32
    %c0_i32_1 = arith.constant 0 : i32
    return %arg1, %c0_i32, %c0_i32_0 : i32, i32, i32
  }
  func.func @transform_21(%arg0: i32, %arg1: i32) -> (i32, i32, i32) {
    %c0_i32 = arith.constant 0 : i32
    %c0_i32_0 = arith.constant 0 : i32
    %c0_i32_1 = arith.constant 0 : i32
    return %arg0, %c0_i32, %c0_i32_0 : i32, i32, i32
  }
}

</mosaic_0001>

<bundles_post_ra>
// kernel: tpu_custom_call.1
= control target key start
LH: loop header
LB: loop body
LE: loop exit
PB: predicated region body
PF: predicated region fallthrough
CT: control target
= control target key end

     0   :  { %s3542_s0 = inlined_call_operand.hbm [shape: f32[2,8,32], index: 0, kind: input, shape index: {}]   ;;  %s3543_s1 = inlined_call_operand.vmem [shape: f32[2,16,32], index: 1, kind: input, shape index: {}]   ;;  %s3544_s2 = inlined_call_operand.hbm [shape: f32[2,1,16], index: 2, kind: input, shape index: {}]   ;;  %s3545_s3 = inlined_call_operand.hbm [shape: f32[2,1,32], index: 3, kind: input, shape index: {}]   ;;  %s3546_s4 = inlined_call_operand.vmem [shape: f32[2,1,32], index: 4, kind: input, shape index: {}]   ;;  %s3547_s5 = inlined_call_operand.hbm [shape: f32[2,1,32], index: 5, kind: input, shape index: {}]   ;;  %s3548_s6 = inlined_call_operand.vmem [shape: f32[2,1,32], index: 6, kind: input, shape index: {}]   ;;  %s3549_s7 = inlined_call_operand.vmem [shape: bf16[2,32,32], index: 7, kind: input, shape index: {}]   ;;  %s3550_s8 = inlined_call_operand.vmem [shape: f32[2,1,32], index: 8, kind: input, shape index: {}]   ;;  %s3551_s9 = inlined_call_operand.vmem [shape: bf16[2,32,32], index: 9, kind: input, shape index: {}]   ;;  %s3552_s10 = inlined_call_operand.vmem [shape: f32[2,1,32], index: 10, kind: input, shape index: {}]   ;;  %s3553_s11 = inlined_call_operand.vmem [shape: bf16[2,32,32], index: 11, kind: input, shape index: {}]   ;;  %s3554_s12 = inlined_call_operand.vmem [shape: f32[2,1,32], index: 12, kind: input, shape index: {}]   ;;  %s3555_s13 = inlined_call_operand.vmem [shape: bf16[2,32,32], index: 13, kind: input, shape index: {}]   ;;  %s3556_s14 = inlined_call_operand.vmem [shape: f32[2,1,32], index: 14, kind: input, shape index: {}]   ;;  %s3557_s15 = inlined_call_operand.hbm [shape: f32[2,1,32], index: 15, kind: input, shape index: {}]   ;;  %s3558_s16 = inlined_call_operand.vmem [shape: f32[2,1,32], index: 16, kind: input, shape index: {}]   ;;  %s3559_s17 = inlined_call_operand.hbm [shape: bf16[2,32,128], index: 17, kind: input, shape index: {}]   ;;  %s3560_s18 = inlined_call_operand.vmem [shape: f32[2,1,128], index: 18, kind: input, shape index: {}]   ;;  %s3561_s19 = inlined_call_operand.vmem [shape: bf16[2,128,32], index: 19, kind: input, shape index: {}]   ;;  %s3562_s20 = inlined_call_operand.vmem [shape: f32[2,1,32], index: 20, kind: input, shape index: {}]   ;;  %s3563_s21 = inlined_call_operand.hbm [shape: f32[2,8,32], index: 21, kind: output, shape index: {}]  }
   0x1   :  { %3586 = sst [smem:[#allocation39_spill]] %s3542_s0 }
   0x2   :  { %3587 = sst [smem:[#allocation40_spill]] %s3543_s1 }
   0x3   :  { %3588 = sst [smem:[#allocation41_spill]] %s3544_s2 }
   0x4   :  { %3589 = sst [smem:[#allocation42_spill]] %s3545_s3 }
   0x5   :  { %3590 = sst [smem:[#allocation43_spill]] %s3546_s4 }
   0x6   :  { %3591 = sst [smem:[#allocation44_spill]] %s3547_s5 }
   0x7   :  { %3592 = sst [smem:[#allocation45_spill]] %s3548_s6 }
   0x8   :  { %3593 = sst [smem:[#allocation46_spill]] %s3549_s7 }
   0x9   :  { %3594 = sst [smem:[#allocation47_spill]] %s3550_s8 }
   0xa   :  { %3595 = sst [smem:[#allocation48_spill]] %s3551_s9 }
   0xb   :  { %3596 = sst [smem:[#allocation49_spill]] %s3552_s10 }
   0xc   :  { %3597 = sst [smem:[#allocation50_spill]] %s3553_s11 }
   0xd   :  { %3598 = sst [smem:[#allocation51_spill]] %s3554_s12 }
   0xe   :  { %3599 = sst [smem:[#allocation52_spill]] %s3555_s13 }
   0xf   :  { %3600 = sst [smem:[#allocation53_spill]] %s3556_s14 }
  0x10   :  { %3601 = sst [smem:[#allocation54_spill]] %s3557_s15 }
  0x11   :  { %3602 = sst [smem:[#allocation55_spill]] %s3558_s16 }
  0x12   :  { %3603 = sst [smem:[#allocation56_spill]] %s3559_s17 }
  0x13   :  { %3604 = sst [smem:[#allocation57_spill]] %s3560_s18 }
  0x14   :  { %3605 = sst [smem:[#allocation58_spill]] %s3561_s19 }
  0x15   :  { %3606 = sst [smem:[#allocation59_spill]] %s3562_s20 }
  0x16   :  { %3607 = sst [smem:[#allocation60_spill]] %s3563_s21 }
  0x17   :  { %26 = vsyncpa [#allocation4], 0 }
  0x18   :  { %28 = vsyncpa [#allocation4 + $0x1], 0 }
  0x19   :  { %29 = vsyncpa [#allocation7], 0 }
  0x1a   :  { %31 = vsyncpa [#allocation7 + $0x1], 0 }
  0x1b   :  { %32 = vsyncpa [#allocation10], 0 }
  0x1c   :  { %34 = vsyncpa [#allocation10 + $0x1], 0 }
  0x1d   :  { %35 = vsyncpa [#allocation13], 0 }
  0x1e   :  { %37 = vsyncpa [#allocation13 + $0x1], 0 }
  0x1f   :  { %38 = vsyncpa [#allocation5], 0 }
  0x20   :  { %40 = vsyncpa [#allocation5 + $0x1], 0  ;;  %s3019_s2 = smov 0   ;;  %s3021_s25 = smov 0  }
  0x21   :  { %s3023_s26 = smov 0   ;;  %s3025_s27 = smov 0  }
  0x22   :  { %s3027_s3 = smov 0   ;;  %s3029_s28 = smov 0  }
  0x23   :  { %s3031_s29 = smov 0   ;;  %s3033_s0 = smov 0  }
  0x24   :  { %s3035_s4 = smov 0   ;;  %s3037_s30 = smov 0  }
  0x25   :  { %s3039_s5 = smov 0  }
  0x26 LB: > { %3608 = sst [smem:[#allocation21_spill]] %s2862_s25  ;;  %s3073_s22 = sadd.s32 4294967295, %s2898_s5   ;;  %s2898_s5 = sphi %s3039_s5, %s46_s5   ;;  %s2894_s30 = sphi %s3037_s30, %s3700_s30   ;;  %s2890_s4 = sphi %s3035_s4, %s3699_s4   ;;  %s2886_s0 = sphi %s3033_s0, %s3698_s0   ;;  %s2882_s29 = sphi %s3031_s29, %s3697_s29   ;;  %s2878_s28 = sphi %s3029_s28, %s3696_s28   ;;  %s2874_s3 = sphi %s3027_s3, %s3695_s3   ;;  %s2870_s27 = sphi %s3025_s27, %s3694_s27   ;;  %s2866_s26 = sphi %s3023_s26, %s3693_s26   ;;  %s2862_s25 = sphi %s3021_s25, %s3692_s25   ;;  %s2858_s2 = sphi %s3019_s2, %s3691_s2  }
  0x27   : > { %3609 = sst [smem:[#allocation22_spill]] %s2866_s26  ;;  %s2232_s23 = sadd.s32 4294967294, %s2898_s5  }
  0x28   : > { %3610 = sst [smem:[#allocation23_spill]] %s2870_s27  ;;  %p72_p0 = scmp.ne.s32.totalorder %s2878_s28, %s2874_s3 }
  0x29   : > { %3611 = sst [smem:[#allocation24_spill]] %s2874_s3  ;;  %p73_p1 = scmp.eq.s32.totalorder %s2898_s5, 0 }
  0x2a   : > { %3612 = sst [smem:[#allocation25_spill]] %s2878_s28  ;;  %p78_p2 = scmp.ne.s32.totalorder %s2874_s3, %s2870_s27 }
  0x2b   : > { %3613 = sst [smem:[#allocation26_spill]] %s2882_s29  ;;  %p79_p3 = scmp.eq.s32.totalorder %s3073_s22, 0 }
  0x2c   : > { %3614 = sst [smem:[#allocation27_spill]] %s2886_s0  ;;  %p3087_p4 = por %p73_p1, %p72_p0 }
  0x2d   : > { %3615 = sst [smem:[#allocation28_spill]] %s2890_s4  ;;  %p3092_p5 = por %p79_p3, %p78_p2 }
  0x2e   : > { %3616 = sst [smem:[#allocation29_spill]] %s2894_s30  ;;  %p150_p6 = scmp.ne.s32.totalorder %s2866_s26, %s2862_s25 }
  0x2f   : > { %3617 = sst [smem:[#allocation30_spill]] %s2898_s5  ;;  %p156_p7 = scmp.ne.s32.totalorder %s2862_s25, %s2858_s2 }
  0x30   : > { %p622_p8 = scmp.eq.s32.totalorder %s3073_s22, 3  ;;  %p3100_p9 = por %p150_p6, %p73_p1 }
  0x31   : > { %p628_p10 = scmp.eq.s32.totalorder %s2232_s23, 3  ;;  %p3104_p11 = por %p156_p7, %p79_p3 }
  0x32   : > { %p3111_p12 = por %p622_p8, %p72_p0  ;;  %p2410_p1 = scmp.lt.s32.totalorder %s2898_s5, 4 }
  0x33   : > { %s3621_s1 = scalar_select %p3104_p11, 1, 0 }
  0x34   : > { %s3623_s19 = scalar_select %p3111_p12, 1, 0 }
  0x35   : > { %3622 = sst [smem:[#allocation31_spill]] %s3621_s1  ;;  %p3115_p13 = por %p628_p10, %p78_p2 }
  0x36   : > { %3624 = sst [smem:[#allocation32_spill]] %s3623_s19  ;;  %s3121_s27 = sand.u32 1, %s2878_s28  }
  0x37   : > { %s3625_s2 = scalar_select %p3115_p13, 1, 0 }
  0x38   : > { %s3569_s23 = sand.u32 1, %s2898_s5   ;;  %p3126_p3 = pnand %p2410_p1, %p3087_p4 }
  0x39   : > { %3626 = sst [smem:[#allocation33_spill]] %s3625_s2  ;;  %s678_s2 = scalar_lea.vmem [#allocation6], %s3121_s27 }
  0x3a   : > { %s3628_s19 = sld [smem:[#allocation41_spill]]  ;;  %s685_s12 = sshll.u32 %s678_s2, 4  ;;  %s686_s12 = int_to_ptr.vmem [resolvable:$true] %s685_s12 }
  0x3b   : > { %s3137_s21 = scalar_lea.sflag [#allocation7], %s3569_s23  ;;  %p3144_p0 = pnand %p2410_p1, %p3100_p9 }
  0x3c   : > { %p2240_p2 = scmp.ge.s32.totalorder %s2898_s5, 1  ;;  %p857_p4 = scmp.lt.s32.totalorder %s2898_s5, 5 }
  0x3d   : > { %s55_s16 = sadd.s32 1, %s2890_s4  ;;  %s3633_s23 = sld [smem:[#allocation44_spill]] }
  0x3e   : > { %p3150_p6 = pnand %p2240_p2, %p857_p4  ;;  %p56_p7 = scmp.ge.s32.totalorder %s55_s16, 2 }
  0x3f   : > { %s3635_s6 = sadd.s32 1, %s2866_s26  ;;  %s3642_s15 = sld [smem:[#allocation54_spill]] }
  0x40   : > { %s681_s13 = scalar_lea.hbm %s3628_s19, %s2894_s30  ;;  %s3156_s19 = sand.u32 1, %s2866_s26  }
  0x41   : > { %s683_s11 = sshll.u32 %s681_s13, 4  ;;  %s3702_s16 = smov (%p56_p7, %s55_s16), 0  ;;  %s684_s11 = int_to_ptr.hbm [resolvable:$true] %s683_s11 }
  0x42   : > { %2393 = dma.hbm_to_vmem [thread:$0]  (!%p3126_p3), %s684_s11, 16, %s686_s12, %s3137_s21  }
  0x43   : > { %3631 = sst [smem:[#allocation34_spill]] %s3702_s16  ;;  %s3632_s11 = sadd.s32 1, %s2894_s30 }
  0x44   : > { %s3704_s11 = smov (!%p56_p7, %s3632_s11), %s2894_s30  ;;  %s140_s12 = ssub.s32 %s2890_s4, %s3702_s16 }
  0x45   : > { %s721_s10 = scalar_lea.hbm %s3633_s23, %s2890_s4  ;;  %p60_p8 = scmp.ge.s32.totalorder %s3704_s11, 2 }
  0x46   : > { %p141_p9 = scmp.eq.s32.totalorder %s140_s12, 0  ;;  %s723_s9 = sshll.u32 %s721_s10, 4  ;;  %s724_s9 = int_to_ptr.hbm [resolvable:$true] %s723_s9 }
  0x47   : > { %s718_s8 = scalar_lea.vmem [#allocation9], %s3156_s19  ;;  %s3706_s11 = smov (%p60_p8, %s3704_s11), 0 }
  0x48   : > { %s725_s7 = sshll.u32 %s718_s8, 4  ;;  %3634 = sst [smem:[#allocation35_spill]] %s3706_s11  ;;  %s726_s7 = int_to_ptr.vmem [resolvable:$true] %s725_s7 }
  0x49   : > { %s3175_s29 = scalar_select %p141_p9, %s2866_s26, %s3635_s6  }
  0x4a   : > { %s62_s0 = ssub.s32 %s2894_s30, %s3706_s11  ;;  %s3637_s23 = sand.u32 1, %s2898_s5  }
  0x4b   : > { %3636 = sst [smem:[#allocation36_spill]] %s3175_s29  ;;  %p63_p10 = scmp.eq.s32.totalorder %s62_s0, 0 }
  0x4c   : > { %s716_s24 = scalar_lea.sflag [#allocation10], %s3637_s23  ;;  %s3638_s10 = sadd.s32 1, %s2878_s28 }
  0x4d   : > { %2399 = dma.hbm_to_vmem [thread:$0]  (!%p3144_p0), %s724_s9, 16, %s726_s7, %s716_s24  }
  0x4e   : > { %s3186_s8 = scalar_select %p63_p10, %s2878_s28, %s3638_s10  }
  0x4f   : > { %s2235_s12 = sshll.u32 %s3121_s27, 3  ;;  %s2236_s6 = sshll.u32 %s2894_s30, 3 }
  0x50   : > { %3639 = sst [smem:[#allocation37_spill]] %s3186_s8  ;;  %s652_s0 = scalar_lea.vmem [#allocation3], %s2235_s12 }
  0x51   : > { %s3640_s11 = sld [smem:[#allocation39_spill]]  ;;  %s660_s26 = sshll.u32 %s652_s0, 4  ;;  %s661_s26 = int_to_ptr.vmem [resolvable:$true] %s660_s26 }
  0x52   : > { %s649_s7 = scalar_lea.sflag [#allocation4], %s3121_s27  ;;  %s3641_s10 = sld [smem:[#allocation42_spill]] }
  0x53   : > { %s695_s8 = scalar_lea.vmem [#allocation8], %s3156_s19  ;;  %s800_s27 = scalar_lea.hbm %s3642_s15, %s2890_s4 }
  0x54   : > { %s702_s16 = sshll.u32 %s695_s8, 4  ;;  %s797_s18 = scalar_lea.vmem [#allocation11], %s3156_s19  ;;  %s703_s16 = int_to_ptr.vmem [resolvable:$true] %s702_s16 }
  0x55   : > { %s804_s12 = sshll.u32 %s797_s18, 4  ;;  %s2348_s8 = sshll.u32 %s2890_s4, 4  ;;  %s805_s12 = int_to_ptr.vmem [resolvable:$true] %s804_s12 }
  0x56   : > { %s3643_s17 = sld [smem:[#allocation56_spill]]  ;;  %s818_s23 = scalar_lea.sflag [#allocation13], %s3156_s19 }
  0x57   : > { %s656_s29 = scalar_lea.hbm %s3640_s11, %s2236_s6 }
  0x58   : > { %s658_s1 = sshll.u32 %s656_s29, 4  ;;  %s698_s30 = scalar_lea.hbm %s3641_s10, %s2890_s4  ;;  %s659_s1 = int_to_ptr.hbm [resolvable:$true] %s658_s1 }
  0x59   : > { %2390 = dma.hbm_to_vmem [thread:$0]  (!%p3126_p3), %s659_s1, 128, %s661_s26, %s649_s7  }
  0x5a   : > { %s700_s2 = sshll.u32 %s698_s30, 4  ;;  %s802_s26 = sshll.u32 %s800_s27, 4  ;;  %s701_s2 = int_to_ptr.hbm [resolvable:$true] %s700_s2  ;;  %s803_s26 = int_to_ptr.hbm [resolvable:$true] %s802_s26 }
  0x5b   : > { %2396 = dma.hbm_to_vmem [thread:$0]  (!%p3144_p0), %s701_s2, 16, %s703_s16, %s3137_s21  }
  0x5c   : > { %2402 = dma.hbm_to_vmem [thread:$0]  (!%p3144_p0), %s803_s26, 16, %s805_s12, %s716_s24  }
  0x5d   : > { %s2237_s1 = sshll.u32 %s3156_s19, 4  ;;  %s826_s0 = scalar_lea.hbm %s3643_s17, %s2348_s8 }
  0x5e   : > { %s827_s21 = sshll.u32 %s826_s0, 4  ;;  %s821_s7 = scalar_lea.vmem [#allocation12], %s2237_s1  ;;  %s828_s21 = int_to_ptr.hbm [resolvable:$true] %s827_s21 }
  0x5f   : > { %s829_s9 = sshll.u32 %s821_s7, 4  ;;  %s2900_s10 = smov 64   ;;  %s830_s9 = int_to_ptr.vmem [resolvable:$true] %s829_s9 }
  0x60   : > { %s2901_s16 = smov 4   ;;  %861 = sbr.rel (%p3150_p6) target bundleno = 2094 (0x82e), region = 104 }
  0x61   : > { %2405 = dma.hbm_to_vmem [thread:$0]  (!%p3144_p0), %s828_s21, 256, %s830_s9, %s818_s23, %s2900_s10, %s2900_s10, %s2901_s16  }
  0x65   : > { %s3222_s24 = sand.u32 1, %s2874_s3  }
  0x66   : > { %s3578_s2 = sshll.u32 %s3222_s24, 3  ;;  %s864_s29 = scalar_lea.sflag [#allocation4], %s3222_s24 }
  0x67   : > { %s3228_s11 = scalar_lea.vmem [#allocation3], %s3578_s2 }
  0x68   : > { %2833 = dma.done.wait (%p3092_p5), %s864_s29, 128  }
  0x69   : > { %2835 = vsyncadd (%p3092_p5), %s864_s29, 4294967168  ;;  %s873_s14 = sand.u32 1, %s3073_s22  }
  0x6a   : > { %s874_s13 = scalar_lea.sflag [#allocation7], %s873_s14 }
  0x6b   : > { %2837 = dma.done.wait (%p3092_p5), %s874_s13, 16  }
  0x6c   : > { %2839 = vsyncadd (%p3092_p5), %s874_s13, 4294967280  ;;  %s3241_s18 = sand.u32 1, %s2862_s25  }
  0x6d   : > { %2841 = dma.done.wait (%p3104_p11), %s874_s13, 16  }
  0x6e   : > { %2843 = vsyncadd (%p3104_p11), %s874_s13, 4294967280  ;;  %s892_s22 = scalar_lea.sflag [#allocation10], %s873_s14 }
  0x6f   : > { %2845 = dma.done.wait (%p3104_p11), %s892_s22, 32  }
  0x70   : > { %2847 = vsyncadd (%p3104_p11), %s892_s22, 4294967264  ;;  %s2242_s20 = sshll.u32 %s3241_s18, 4  ;;  %s910_s8 = scalar_lea.sflag [#allocation13], %s3241_s18 }
  0x71   : > { %s3256_s30 = scalar_lea.vmem [#allocation12], %s2242_s20 }
  0x72   : > { %3645 = sst [smem:[#allocation38_spill]] %s3256_s30 }
  0x73   : > { %2849 = dma.done.wait (%p3104_p11), %s910_s8, 256  }
  0x74   : > { %2851 = vsyncadd (%p3104_p11), %s910_s8, 4294967040  ;;  %s3646_s6 = sld [smem:[#allocation27_spill]] }
  0x75   : > { %s3647_s0 = sld [smem:[#allocation26_spill]] }
  0x76   : > { %s3648_s10 = sld [smem:[#allocation40_spill]] }
  0x77   : > { %s3651_s2 = sld [smem:[#allocation46_spill]] }
  0x78   : > { %s3653_s4 = sld [smem:[#allocation48_spill]] }
  0x79   : > { %s3655_s1 = sld [smem:[#allocation50_spill]] }
  0x7a   : > { %p1051_p5 = scmp.lt.s32.totalorder %s3646_s6, 1  ;;  %s3657_s9 = sld [smem:[#allocation52_spill]] }
  0x7b   : > { %p1056_p1 = scmp.lt.s32.totalorder %s3647_s0, 1  ;;  %s3659_s22 = sld [smem:[#allocation55_spill]] }
  0x7c   : > { %s3708_s6 = smov (!%p1051_p5, %s3646_s6), 1  ;;  %s3660_s8 = sld [smem:[#allocation57_spill]] }
  0x7d   : > { %s3266_s21 = scalar_select %p1056_p1, %s3647_s0, 1 }
  0x7e   : > { %s2349_s7 = sshll.u32 %s3708_s6, 4  ;;  %s3661_s26 = sld [smem:[#allocation59_spill]] }
  0x7f   : > { %s1055_s16 = scalar_lea.vmem %s3648_s10, %s2349_s7  ;;  %s2350_s19 = sshll.u32 %s3266_s21, 4 }
  0x80   : > { %s3283_s15 = scalar_lea.vmem %s3651_s2, %s2350_s19  ;;  %s3292_s29 = scalar_lea.vmem %s3653_s4, %s2350_s19 }
  0x81   : > { %s3301_s28 = scalar_lea.vmem %s3655_s1, %s2350_s19  ;;  %s3310_s23 = scalar_lea.vmem %s3657_s9, %s2350_s19 }
  0x82   : > { %s3658_s10 = sld [smem:[#allocation53_spill]]  ;;  %s1096_s20 = scalar_lea.vmem %s3659_s22, %s3266_s21 }
  0x83   : > { %s1099_s5 = scalar_lea.vmem %s3660_s8, %s3266_s21  ;;  %s2354_s30 = sshll.u32 %s3266_s21, 6 }
  0x84   : > { %s1107_s3 = scalar_lea.vmem %s3661_s26, %s3266_s21  ;;  %s3662_s6 = sld [smem:[#allocation58_spill]] }
  0x85   : > { %s3663_s4 = sshll.u32 %s3222_s24, 3  ;;  %p2256_p11 = scmp.ne.s32.totalorder %s3647_s0, 0 }
  0x86   : > { %s3336_s7 = scalar_lea.vmem [#allocation14], %s3663_s4 }
  0x87   : > { %1112 = sbr.rel (%p2256_p11) target bundleno = 142 (0x8e), region = 132 }
  0x88   : > { %s1093_s25 = scalar_lea.vmem %s3658_s10, %s3266_s21 }
  0x8a   : > { %s3332_s9 = scalar_lea.vmem %s3662_s6, %s2354_s30 }
  0x8c   : > { %v1113_v0 = vld [vmem:[%s3228_s11] sm:$0xff]  ;;  %vm1114_vm0 = vcmask 261120  }
  0x8d   : > { %1115 = vst.msk [vmem:[#allocation2] sm:$0xff] %vm1114_vm0, %v1113_v0 }
  0x8e PF: > { %v1117_v1 = vld [vmem:[%s1055_s16] sm:$0xff]  ;;  %vm1122_vm1 = vcmask 261120   ;;  %v1118_v5 = vld [vmem:[%s1055_s16 + $0x8] sm:$0xff]  ;;  %v2902_v7 = vmov 32.0   ;;  %s3665_s30 = sld [smem:[#allocation45_spill]]  ;;  %s3667_s16 = scalar_lea.vmem [#allocation8], %s3241_s18 }
  0x8f   : > { %v1162_v3 = vsel %vm1122_vm1, %v1117_v1, 0.0  ;;  %v1165_v6 = vsel %vm1122_vm1, %v1118_v5, 0.0  ;;  %2552 = vrcp.f32 %v2902_v7  ;;  %v2358_v29 = vld [vmem:[%s3292_s29 + $0x8] sm:$0xff]  ;;  %v2357_v32 = vld [vmem:[%s3292_s29] sm:$0xff]  ;;  %s3668_s14 = sld [smem:[#allocation43_spill]]  ;;  %s2903_s2 = smov 112  }
  0x90   : > { %1163 = vadd.xlane.f32.xlu0 %v1162_v3  ;;  %1283 = vmatpush.bf16.msra.mxu2 %v2358_v29  ;;  %v2356_v34 = vld [vmem:[%s3283_s15 + $0x8] sm:$0xff]  ;;  %v2355_v36 = vld [vmem:[%s3283_s15] sm:$0xff]  ;;  %s3664_s15 = scalar_lea.vmem [#allocation9], %s3241_s18  ;;  %s3670_s1 = sld [smem:[#allocation49_spill]]  ;;  %vm1403_vm12 = vcmask 64512   ;;  %vm1495_vm13 = vcmask 130048  }
  0x91   : > { %1246 = vmatpush.bf16.msra.mxu0 %v2356_v34  ;;  %v2360_v42 = vld [vmem:[%s3301_s28 + $0x8] sm:$0xff]  ;;  %v2359_v45 = vld [vmem:[%s3301_s28] sm:$0xff]  ;;  %s2904_s12 = smov 120   ;;  %s2905_s26 = smov 104   ;;  %vm1646_vm14 = vcmask 195584  }
  0x92   : > { %v2539_v58 = vld [vmem:[%s3664_s15] ss:$0 sm:$0xff]  ;;  %s3672_s6 = sld [smem:[#allocation47_spill]]  ;;  %s2907_s29 = smov 8  }
  0x93   : > { %s3674_s11 = sld [smem:[#allocation51_spill]]  ;;  %s2908_s10 = smov 24  }
  0x94   : > { %v3340_v2 = vld [vmem:[#allocation2] sm:$0xff]  ;;  %1284 = vmatpush.bf16.msra.mxu2 %v2357_v32  ;;  %s3666_s0 = scalar_lea.vmem %s3665_s30, %s3266_s21 }
  0x95   : > { %v1123_v4 = vsel %vm1122_vm1, %v3340_v2, 0.0  ;;  %v2553_v8 = vpop.eup %2552  ;;  %1247 = vmatpush.bf16.msra.mxu0 %v2355_v36  ;;  %s3669_s13 = scalar_lea.vmem %s3668_s14, %s3266_s21  ;;  %s3677_s14 = sld [smem:[#allocation38_spill]] }
  0x96   : > { %1124 = vadd.xlane.f32.xlu1 %v1123_v4  ;;  %v1127_v9 = vmul.f32 32.0, %v2553_v8  ;;  %vm1131_vm2 = vweird.f32 %v2553_v8  ;;  %s3671_s8 = scalar_lea.vmem %s3670_s1, %s3266_s21 }
  0x98   : > { %1166 = vadd.xlane.f32.xlu0 %v1165_v6  ;;  %v1128_v10 = vsub.f32 1.0, %v1127_v9  ;;  %1317 = vmatpush.bf16.msrb.mxu2 %v2360_v42  ;;  %s3673_s4 = scalar_lea.vmem %s3672_s6, %s3266_s21 }
  0x99   : > { %s3675_s30 = scalar_lea.vmem %s3674_s11, %s3266_s21 }
  0x9a   : > { %v1129_v11 = vmul.f32 %v2553_v8, %v1128_v10  ;;  %v2541_v10 = vld [vmem:[%s3667_s16] ss:$0 sm:$0xff]  ;;  %s2906_s16 = smov 16  }
  0x9c   : > { %v1130_v12 = vadd.f32 %v2553_v8, %v1129_v11  ;;  %1318 = vmatpush.bf16.msrb.mxu2 %v2359_v45 }
  0x9e   : > { %v3346_v13 = vsel %vm1131_vm2, %v2553_v8, %v1130_v12 }
 0x103   : > { %v1164_v14 = vpop.xlane.xlu0 %1163 }
 0x104   : > { %v1168_v15 = vmul.f32 %v1164_v14, %v3346_v13  ;;  %v2542_v14 = vld [vmem:[%s3669_s13] ss:$0 sm:$0xff] }
 0x106   : > { %v1170_v16 = vsub.f32 %v1117_v1, %v1168_v15  ;;  %v2540_v1 = vld [vmem:[%s3666_s0] ss:$0 sm:$0xff]  ;;  %s3676_s0 = scalar_lea.vmem [#allocation6], %s3222_s24 }
 0x108   : > { %v1172_v17 = vmul.f32 %v1170_v16, %v1170_v16 }
 0x109   : > { %v1125_v18 = vpop.xlane.xlu1 %1124 }
 0x10a   : > { %v1174_v19 = vsel %vm1122_vm1, %v1172_v17, 0.0  ;;  %v1133_v22 = vmul.f32 %v3346_v13, %v1125_v18 }
 0x10b   : > { %v1167_v20 = vpop.xlane.xlu0 %1166  ;;  %1175 = vadd.xlane.f32.xlu1 %v1174_v19  ;;  %v2543_v19 = vld [vmem:[%s3671_s8] ss:$0 sm:$0xff] }
 0x10c   : > { %v1169_v21 = vmul.f32 %v1167_v20, %v3346_v13  ;;  %v3353_v25 = vsub.f32 %v3340_v2, %v1133_v22 }
 0x10e   : > { %v1171_v23 = vsub.f32 %v1118_v5, %v1169_v21  ;;  %v1135_v27 = vmul.f32 %v3353_v25, %v3353_v25 }
 0x110   : > { %v1173_v24 = vmul.f32 %v1171_v23, %v1171_v23  ;;  %v1136_v28 = vsel %vm1122_vm1, %v1135_v27, 0.0 }
 0x112   : > { %v1177_v26 = vsel %vm1122_vm1, %v1173_v24, 0.0 }
 0x113   : > { %1178 = vadd.xlane.f32.xlu2 %v1177_v26 }
 0x11b   : > { %1137 = vadd.xlane.f32.xlu2 %v1136_v28 }
 0x17e   : > { %v1176_v30 = vpop.xlane.xlu1 %1175 }
 0x17f   : > { %v1180_v31 = vmul.f32 %v1176_v30, %v3346_v13  ;;  %v2544_v30 = vld [vmem:[%s3673_s4] ss:$0 sm:$0xff] }
 0x181   : > { %v1182_v33 = vadd.f32 1e-05, %v1180_v31 }
 0x183   : > { %2554 = vrsqrt.f32 %v1182_v33  ;;  %vm1190_vm4 = vweird.f32 %v1182_v33 }
 0x186   : > { %v1179_v35 = vpop.xlane.xlu2 %1178 }
 0x187   : > { %v1181_v37 = vmul.f32 %v1179_v35, %v3346_v13 }
 0x189   : > { %v2555_v38 = vpop.eup %2554  ;;  %v1183_v39 = vadd.f32 1e-05, %v1181_v37 }
 0x18a   : > { %v1185_v40 = vmul.f32 %v2555_v38, %v1182_v33  ;;  %vm1191_vm3 = vweird.f32 %v2555_v38  ;;  %v2545_v33 = vld [vmem:[%s3675_s30] ss:$0 sm:$0xff] }
 0x18b   : > { %2556 = vrsqrt.f32 %v1183_v39  ;;  %vm1192_vm5 = vmor %vm1190_vm4, %vm1191_vm3  ;;  %vm1200_vm7 = vweird.f32 %v1183_v39 }
 0x18c   : > { %v1186_v41 = vmul.f32 %v2555_v38, %v1185_v40 }
 0x18e   : > { %v1187_v43 = vmul.f32 0.5, %v1186_v41  ;;  %v1138_v44 = vpop.xlane.xlu2 %1137 }
 0x18f   : > { %v1139_v46 = vmul.f32 %v1138_v44, %v3346_v13 }
 0x190   : > { %v1188_v47 = vsub.f32 1.5, %v1187_v43 }
 0x191   : > { %v2557_v48 = vpop.eup %2556  ;;  %v1140_v49 = vadd.f32 1e-05, %v1139_v46 }
 0x192   : > { %v1189_v50 = vmul.f32 %v2555_v38, %v1188_v47  ;;  %v1195_v51 = vmul.f32 %v2557_v48, %v1183_v39  ;;  %vm1201_vm6 = vweird.f32 %v2557_v48 }
 0x193   : > { %2558 = vrsqrt.f32 %v1140_v49  ;;  %vm1202_vm8 = vmor %vm1200_vm7, %vm1201_vm6  ;;  %vm1147_vm9 = vweird.f32 %v1140_v49 }
 0x194   : > { %v1196_v52 = vmul.f32 %v2557_v48, %v1195_v51  ;;  %v1193_v53 = vsel %vm1192_vm5, %v2555_v38, %v1189_v50 }
 0x195   : > { %v1204_v57 = vmul.f32 %v1193_v53, %v1170_v16 }
 0x196   : > { %v1197_v54 = vmul.f32 0.5, %v1196_v52 }
 0x197   : > { %v1209_v0 = vmul.f32 %v2539_v58, %v1204_v57 }
 0x198   : > { %v1198_v55 = vsub.f32 1.5, %v1197_v54 }
 0x199   : > { %v2559_v56 = vpop.eup %2558  ;;  %v1214_v6 = vadd.f32 %v2540_v1, %v1209_v0 }
 0x19a   : > { %v1199_v59 = vmul.f32 %v2557_v48, %v1198_v55  ;;  %v1142_v60 = vmul.f32 %v2559_v56, %v1140_v49  ;;  %vm1148_vm10 = vweird.f32 %v2559_v56 }
 0x19b   : > { %vm1149_vm11 = vmor %vm1147_vm9, %vm1148_vm10 }
 0x19c   : > { %v1203_v61 = vsel %vm1202_vm8, %v2557_v48, %v1199_v59  ;;  %v1143_v62 = vmul.f32 %v2559_v56, %v1142_v60 }
 0x19d   : > { %v1205_v63 = vmul.f32 %v1203_v61, %v1171_v23 }
 0x19e   : > { %v1144_v3 = vmul.f32 0.5, %v1143_v62 }
 0x19f   : > { %v1210_v4 = vmul.f32 %v2539_v58, %v1205_v63 }
 0x1a0   : > { %v1145_v5 = vsub.f32 1.5, %v1144_v3 }
 0x1a1   : > { %v1215_v7 = vadd.f32 %v2540_v1, %v1210_v4 }
 0x1a2   : > { %v1146_v8 = vmul.f32 %v2559_v56, %v1145_v5 }
 0x1a3   : > { %v1253_v9 = vpack.c.bf16 %v1215_v7, %v1214_v6 }
 0x1a4   : > { %v1150_v11 = vsel %vm1149_vm11, %v2559_v56, %v1146_v8 }
 0x1a5   : > { %2274 = vmatmul.msk.bf16.vlgmr.msra.gmra.mxu2 %vm1122_vm1, %v1253_v9  ;;  %v1151_v12 = vmul.f32 %v1150_v11, %v3353_v25 }
 0x1a7   : > { %v1155_v15 = vmul.f32 %v2541_v10, %v1151_v12 }
 0x1a9   : > { %v1159_v16 = vadd.f32 %v2542_v14, %v1155_v15 }
 0x1ab   : > { %v1216_v17 = vpack.c.bf16 %v1159_v16, %v1159_v16 }
 0x1ad   : > { %2265 = vmatmul.msk.bf16.vlgmr.msra.gmra.mxu0 %vm1122_vm1, %v1216_v17 }
 0x1b5   : > { %2283 = vmatmul.msk.bf16.vlgmr.msrb.gmra.mxu2 %vm1122_vm1, %v1253_v9 }
 0x228   : > { %v1286_v18 = vpop.f32.mrf.mxu2 }
 0x229   : > { %v1287_v21 = vadd.f32 %v2543_v19, %v1286_v18 }
 0x22a   : > { %v1249_v20 = vpop.f32.mrf.mxu0 }
 0x22b   : > { %v1359_v24 = vpack.c.bf16 %v1287_v21, %v1287_v21  ;;  %v1250_v35 = vadd.f32 %v2544_v30, %v1249_v20 }
 0x22d   : > { %v1400_v28 = vunpack.c.l.b16 %v1359_v24  ;;  %v1335_v37 = vpack.c.bf16 %v1250_v35, %v1250_v35 }
 0x230   : > { %v1288_v22 = vpop.f32.mrf.mxu2 }
 0x231   : > { %v1289_v23 = vadd.f32 %v2543_v19, %v1288_v22  ;;  %v2546_v19 = vld [vmem:[%s3676_s0] ss:$0 sm:$0xff] }
 0x232   : > { %v1251_v25 = vpop.f32.mrf.mxu0 }
 0x233   : > { %v2519_v26 = vpack.i.bf16 %v1289_v23, %v1287_v21  ;;  %v1360_v27 = vpack.c.bf16 %v1289_v23, %v1289_v23 }
 0x235   : > { %2520 = vrot.lane.b32.xlu2 %v2519_v26, %s2903_s2  ;;  %2515 = vrot.lane.b32.xlu1 %v2519_v26, %s2904_s12  ;;  %v1401_v29 = vunpack.c.l.b16 %v1360_v27 }
 0x236   : > { %2510 = vrot.lane.b32.xlu0 %v2519_v26, %s2905_s26 }
 0x237   : > { %v1402_v31 = vpack.c.b16 %v1401_v29, %v1400_v28 }
 0x238   : > { %v1320_v32 = vpop.f32.mrf.mxu2 }
 0x239   : > { %v1408_v34 = vsel %vm1403_vm12, %v1402_v31, 0  ;;  %v1321_v36 = vadd.f32 %v2545_v33, %v1320_v32 }
 0x23a   : > { %1417 = vmatpush.bf16.xpose.msra.mxu3 %v1408_v34 }
 0x23b   : > { %v1387_v40 = vpack.c.bf16 %v1321_v36, %v1321_v36 }
 0x23d   : > { %1326 = vrot.lane.b32.xlu2 %v1250_v35, %s2904_s12  ;;  %1329 = vrot.lane.b32.xlu1 %v1250_v35, %s2903_s2  ;;  %v1546_v43 = vunpack.c.l.b16 %v1387_v40 }
 0x23e   : > { %1332 = vrot.lane.b32.xlu0 %v1250_v35, %s2905_s26 }
 0x240   : > { %v1322_v38 = vpop.f32.mrf.mxu2 }
 0x241   : > { %v1323_v39 = vadd.f32 %v2545_v33, %v1322_v38  ;;  %2284 = vmatmul.msk.bf16.vlgmr.msra.gmra.mxu3 %vm1403_vm12, %v1335_v37 }
 0x243   : > { %v1388_v41 = vpack.c.bf16 %v1323_v39, %v1323_v39  ;;  %v3409_v42 = vpack.i.bf16 %v1323_v39, %v1321_v36 }
 0x245   : > { %v1547_v44 = vunpack.c.l.b16 %v1388_v41 }
 0x247   : > { %v1548_v45 = vpack.c.b16 %v1547_v44, %v1546_v43 }
 0x249   : > { %1560 = vmatpush.bf16.msrb.mxu3 %v1548_v45 }
 0x28f   : > { %v2521_v46 = vpop.permute.xlu2 %2520 }
 0x290   : > { %v2523_v47 = vunpack.i.h.bf16 %v2521_v46  ;;  %v2522_v48 = vunpack.i.l.bf16 %v2521_v46 }
 0x292   : > { %v1364_v49 = vpack.c.bf16 %v2523_v47, %v2523_v47  ;;  %v1363_v50 = vpack.c.bf16 %v2522_v48, %v2522_v48 }
 0x294   : > { %v1450_v51 = vunpack.c.l.b16 %v1364_v49  ;;  %v1449_v52 = vunpack.c.l.b16 %v1363_v50 }
 0x296   : > { %v1451_v53 = vpack.c.b16 %v1450_v51, %v1449_v52 }
 0x297   : > { %v1327_v12 = vpop.permute.xlu2 %1326 }
 0x298   : > { %v1456_v54 = vsel %vm1403_vm12, %v1451_v53, 0  ;;  %v1336_v15 = vpack.c.bf16 %v1327_v12, %v1327_v12 }
 0x299   : > { %1465 = vmatpush.bf16.xpose.msra.mxu1 %v1456_v54 }
 0x2a7   : > { %v2516_v55 = vpop.permute.xlu1 %2515 }
 0x2a8   : > { %v2518_v56 = vunpack.i.h.bf16 %v2516_v55  ;;  %v2517_v57 = vunpack.i.l.bf16 %v2516_v55  ;;  %v2511_v58 = vpop.permute.xlu0 %2510 }
 0x2a9   : > { %v2513_v59 = vunpack.i.h.bf16 %v2511_v58  ;;  %v2512_v60 = vunpack.i.l.bf16 %v2511_v58 }
 0x2aa   : > { %v1362_v61 = vpack.c.bf16 %v2518_v56, %v2518_v56  ;;  %v1361_v62 = vpack.c.bf16 %v2517_v57, %v2517_v57 }
 0x2ab   : > { %v1366_v63 = vpack.c.bf16 %v2513_v59, %v2513_v59  ;;  %v1365_v0 = vpack.c.bf16 %v2512_v60, %v2512_v60 }
 0x2ac   : > { %v1426_v1 = vunpack.c.l.b16 %v1362_v61  ;;  %v1425_v3 = vunpack.c.l.b16 %v1361_v62 }
 0x2ad   : > { %v1474_v4 = vunpack.c.l.b16 %v1366_v63  ;;  %v1473_v5 = vunpack.c.l.b16 %v1365_v0 }
 0x2ae   : > { %v1427_v6 = vpack.c.b16 %v1426_v1, %v1425_v3 }
 0x2af   : > { %v1475_v7 = vpack.c.b16 %v1474_v4, %v1473_v5  ;;  %v1330_v8 = vpop.permute.xlu1 %1329 }
 0x2b0   : > { %v1337_v9 = vpack.c.bf16 %v1330_v8, %v1330_v8  ;;  %v1432_v10 = vsel %vm1403_vm12, %v1427_v6, 0  ;;  %v1333_v14 = vpop.permute.xlu0 %1332 }
 0x2b1   : > { %1441 = vmatpush.bf16.xpose.msrb.mxu0 %v1432_v10  ;;  %v1480_v11 = vsel %vm1403_vm12, %v1475_v7, 0  ;;  %v1338_v16 = vpack.c.bf16 %v1333_v14, %v1333_v14 }
 0x2b2   : > { %1489 = vmatpush.bf16.xpose.msra.mxu2 %v1480_v11  ;;  %2286 = vmatmul.msk.bf16.vlgmr.msra.gmra.mxu1 %vm1403_vm12, %v1337_v9 }
 0x2b8   : > { %2285 = vmatmul.msk.bf16.vlgmr.msrb.gmra.mxu0 %vm1403_vm12, %v1336_v15 }
 0x2b9   : > { %2287 = vmatmul.msk.bf16.vlgmr.msra.gmra.mxu2 %vm1403_vm12, %v1338_v16 }
 0x2c4   : > { %v1419_v17 = vpop.f32.mrf.mxu3 }
 0x2c5   : > { %v1420_v31 = vadd.f32 %v2546_v19, %v1419_v17 }
 0x2c7   : > { %v1496_v33 = vsel %vm1495_vm13, %v1420_v31, -inf }
 0x2cc   : > { %v1421_v18 = vpop.f32.mrf.mxu3 }
 0x32f   : > { %v1467_v20 = vpop.f32.mrf.mxu1 }
 0x330   : > { %v1468_v21 = vadd.f32 %v2546_v19, %v1467_v20 }
 0x332   : > { %v1502_v22 = vsel %vm1495_vm13, %v1468_v21, -inf }
 0x333   : > { %1503 = vmax.xlane.f32.xlu1 %v1502_v22 }
 0x335   : > { %v1443_v23 = vpop.f32.mrf.mxu0 }
 0x336   : > { %v1444_v24 = vadd.f32 %v2546_v19, %v1443_v23 }
 0x337   : > { %v1469_v25 = vpop.f32.mrf.mxu1 }
 0x338   : > { %v1499_v26 = vsel %vm1495_vm13, %v1444_v24, -inf }
 0x339   : > { %1500 = vmax.xlane.f32.xlu2 %v1499_v26 }
 0x33c   : > { %v1491_v27 = vpop.f32.mrf.mxu2 }
 0x33d   : > { %v1492_v28 = vadd.f32 %v2546_v19, %v1491_v27  ;;  %v1445_v29 = vpop.f32.mrf.mxu0 }
 0x33f   : > { %v1505_v30 = vsel %vm1495_vm13, %v1492_v28, -inf }
 0x340   : > { %1506 = vmax.xlane.f32.xlu0 %v1505_v30 }
 0x344   : > { %v1493_v32 = vpop.f32.mrf.mxu2 }
 0x348   : > { %1497 = vmax.xlane.f32.xlu0 %v1496_v33 }
 0x34c   : > { %2525 = vrot.lane.b32.xlu1 %v3409_v42, %s2905_s26  ;;  %s3683_s26 = sld [smem:[#allocation26_spill]] }
 0x352   : > { %p2343_p3 = scmp.ne.s32.totalorder %s3683_s26, 1 }
 0x3a6   : > { %v1504_v34 = vpop.xlane.xlu1 %1503 }
 0x3a7   : > { %v1510_v35 = vsub.f32 %v1468_v21, %v1504_v34 }
 0x3a9   : > { %v1516_v36 = vmul.f32 1.442695, %v1510_v35 }
 0x3ab   : > { %2560 = vpow2.f32 %v1516_v36 }
 0x3ac   : > { %v1501_v37 = vpop.xlane.xlu2 %1500 }
 0x3ad   : > { %v1509_v38 = vsub.f32 %v1444_v24, %v1501_v37 }
 0x3af   : > { %v1514_v39 = vmul.f32 1.442695, %v1509_v38 }
 0x3b1   : > { %v2561_v40 = vpop.eup %2560  ;;  %2562 = vpow2.f32 %v1514_v39 }
 0x3b2   : > { %v1526_v41 = vsel %vm1495_vm13, %v2561_v40, 0.0 }
 0x3b3   : > { %v1507_v43 = vpop.xlane.xlu0 %1506  ;;  %1527 = vadd.xlane.f32.xlu2 %v1526_v41  ;;  %v2361_v41 = vld [vmem:[%s3310_s23] sm:$0xff] }
 0x3b4   : > { %v1511_v44 = vsub.f32 %v1492_v28, %v1507_v43 }
 0x3b6   : > { %v1518_v45 = vmul.f32 1.442695, %v1511_v44 }
 0x3b7   : > { %v2563_v46 = vpop.eup %2562 }
 0x3b8   : > { %2564 = vpow2.f32 %v1518_v45  ;;  %v1523_v47 = vsel %vm1495_vm13, %v2563_v46, 0.0 }
 0x3b9   : > { %1524 = vadd.xlane.f32.xlu0 %v1523_v47 }
 0x3bb   : > { %v1498_v48 = vpop.xlane.xlu0 %1497 }
 0x3bc   : > { %v1508_v49 = vsub.f32 %v1420_v31, %v1498_v48 }
 0x3be   : > { %v2565_v50 = vpop.eup %2564  ;;  %v1512_v51 = vmul.f32 1.442695, %v1508_v49  ;;  %v2526_v52 = vpop.permute.xlu1 %2525 }
 0x3bf   : > { %v2528_v53 = vunpack.i.h.bf16 %v2526_v52  ;;  %v2527_v54 = vunpack.i.l.bf16 %v2526_v52  ;;  %v1529_v55 = vsel %vm1495_vm13, %v2565_v50, 0.0 }
 0x3c0   : > { %2566 = vpow2.f32 %v1512_v51  ;;  %1530 = vadd.xlane.f32.xlu2 %v1529_v55 }
 0x3c1   : > { %v1394_v56 = vpack.c.bf16 %v2528_v53, %v2528_v53  ;;  %v1393_v57 = vpack.c.bf16 %v2527_v54, %v2527_v54 }
 0x3c3   : > { %v1613_v58 = vunpack.c.l.b16 %v1394_v56  ;;  %v1612_v59 = vunpack.c.l.b16 %v1393_v57 }
 0x3c5   : > { %v1614_v60 = vpack.c.b16 %v1613_v58, %v1612_v59 }
 0x3c6   : > { %v2567_v61 = vpop.eup %2566 }
 0x3c7   : > { %1626 = vmatpush.bf16.msrb.mxu2 %v1614_v60  ;;  %v1520_v62 = vsel %vm1495_vm13, %v2567_v61, 0.0 }
 0x3c8   : > { %1521 = vadd.xlane.f32.xlu1 %v1520_v62  ;;  %v2363_v62 = vld [vmem:[%s3677_s14] sm:$0xff] }
 0x3cd   : > { %2530 = vrot.lane.b32.xlu0 %v3409_v42, %s2904_s12 }
 0x3d8   : > { %2535 = vrot.lane.b32.xlu2 %v3409_v42, %s2903_s2 }
 0x426   : > { %v1528_v63 = vpop.xlane.xlu2 %1527 }
 0x42c   : > { %v1525_v1 = vpop.xlane.xlu0 %1524 }
 0x433   : > { %v1531_v0 = vpop.xlane.xlu2 %1530 }
 0x434   : > { %2568 = vrcp.f32 %v1531_v0 }
 0x435   : > { %2570 = vrcp.f32 %v1528_v63 }
 0x436   : > { %2572 = vrcp.f32 %v1525_v1 }
 0x43a   : > { %v2569_v3 = vpop.eup %2568 }
 0x43b   : > { %v1539_v4 = vmul.f32 %v2569_v3, %v2565_v50  ;;  %v2536_v5 = vpop.permute.xlu2 %2535  ;;  %v1522_v6 = vpop.xlane.xlu1 %1521  ;;  %v2547_v50 = vld [vmem:[%s1093_s25] ss:$0 sm:$0xff]  ;;  %s3679_s25 = scalar_lea.vmem [#allocation11], %s3241_s18 }
 0x43c   : > { %v2538_v7 = vunpack.i.h.bf16 %v2536_v5  ;;  %v2537_v8 = vunpack.i.l.bf16 %v2536_v5  ;;  %2574 = vrcp.f32 %v1522_v6  ;;  %v2571_v10 = vpop.eup %2570 }
 0x43d   : > { %v1543_v9 = vpack.c.bf16 %v1539_v4, %v1539_v4  ;;  %v2573_v18 = vpop.eup %2572  ;;  %v1538_v19 = vmul.f32 %v2571_v10, %v2561_v40  ;;  %v2362_v40 = vld [vmem:[%s3310_s23 + $0x8] sm:$0xff] }
 0x43e   : > { %v1392_v11 = vpack.c.bf16 %v2538_v7, %v2538_v7  ;;  %v1391_v12 = vpack.c.bf16 %v2537_v8, %v2537_v8  ;;  %v1537_v27 = vmul.f32 %v2573_v18, %v2563_v46  ;;  %1678 = vmatpush.bf16.msra.mxu3 %v2362_v40  ;;  %v2548_v8 = vld [vmem:[%s3679_s25] ss:$0 sm:$0xff]  ;;  %v2370_v18 = vld [vmem:[%s3332_s9 + $0x28] sm:$0xff] }
 0x43f   : > { %2291 = vmatmul.msk.bf16.vlgmr.msrb.gmra.mxu2 %vm1495_vm13, %v1543_v9  ;;  %v2531_v42 = vpop.permute.xlu0 %2530  ;;  %v1542_v29 = vpack.c.bf16 %v1538_v19, %v1538_v19 }
 0x440   : > { %v1591_v14 = vunpack.c.l.b16 %v1392_v11  ;;  %v1590_v15 = vunpack.c.l.b16 %v1391_v12  ;;  %v2533_v16 = vunpack.i.h.bf16 %v2531_v42  ;;  %v2532_v17 = vunpack.i.l.bf16 %v2531_v42 }
 0x441   : > { %v1541_v31 = vpack.c.bf16 %v1537_v27, %v1537_v27 }
 0x442   : > { %v2575_v20 = vpop.eup %2574  ;;  %v1390_v21 = vpack.c.bf16 %v2533_v16, %v2533_v16  ;;  %v1389_v22 = vpack.c.bf16 %v2532_v17, %v2532_v17  ;;  %v1592_v23 = vpack.c.b16 %v1591_v14, %v1590_v15  ;;  %1679 = vmatpush.bf16.msra.mxu3 %v2361_v41  ;;  %v2372_v14 = vld [vmem:[%s3332_s9 + $0x38] sm:$0xff]  ;;  %v2371_v15 = vld [vmem:[%s3332_s9 + $0x30] sm:$0xff]  ;;  %v2550_v16 = vld [vmem:[%s1099_s5] ss:$0 sm:$0xff] }
 0x443   : > { %v1536_v24 = vmul.f32 %v2575_v20, %v2567_v61  ;;  %v2364_v61 = vld [vmem:[%s3677_s14 + $0x8] sm:$0xff] }
 0x444   : > { %v1569_v25 = vunpack.c.l.b16 %v1390_v21  ;;  %v1568_v26 = vunpack.c.l.b16 %v1389_v22  ;;  %1604 = vmatpush.bf16.msrb.mxu1 %v1592_v23  ;;  %v2369_v21 = vld [vmem:[%s3332_s9 + $0x20] sm:$0xff] }
 0x445   : > { %v1540_v28 = vpack.c.bf16 %v1536_v24, %v1536_v24 }
 0x446   : > { %v1570_v30 = vpack.c.b16 %v1569_v25, %v1568_v26  ;;  %v2368_v25 = vld [vmem:[%s3332_s9 + $0x18] sm:$0xff] }
 0x447   : > { %2288 = vmatmul.msk.bf16.vlgmr.msrb.gmra.mxu3 %vm1495_vm13, %v1540_v28  ;;  %2290 = vmatmul.msk.bf16.vlgmr.msrb.gmra.mxu1 %vm1495_vm13, %v1542_v29 }
 0x448   : > { %1582 = vmatpush.bf16.msra.mxu0 %v1570_v30  ;;  %1868 = vmatpush.bf16.msra.mxu1 %v2372_v14  ;;  %v2367_v30 = vld [vmem:[%s3332_s9 + $0x10] sm:$0xff] }
 0x44b   : > { %2289 = vmatmul.msk.bf16.vlgmr.msra.gmra.mxu0 %vm1495_vm13, %v1541_v31 }
 0x44c   : > { %1748 = vmatpush.bf16.msrb.mxu0 %v2364_v61  ;;  %1869 = vmatpush.bf16.msra.mxu1 %v2371_v15 }
 0x450   : > { %1749 = vmatpush.bf16.msrb.mxu0 %v2363_v62  ;;  %1870 = vmatpush.bf16.msra.mxu1 %v2370_v18 }
 0x454   : > { %1871 = vmatpush.bf16.msra.mxu1 %v2369_v21 }
 0x458   : > { %1872 = vmatpush.bf16.msra.mxu1 %v2368_v25 }
 0x45c   : > { %1873 = vmatpush.bf16.msra.mxu1 %v2367_v30 }
 0x4c2   : > { %v1628_v32 = vpop.f32.mrf.mxu2 }
 0x4c4   : > { %v1606_v33 = vpop.f32.mrf.mxu1 }
 0x4c5   : > { %1637 = vrot.lane.b32.xlu2 %v1606_v33, %s2906_s16 }
 0x4c8   : > { %v1584_v34 = vpop.f32.mrf.mxu0 }
 0x4c9   : > { %1633 = vrot.lane.b32.xlu0 %v1584_v34, %s2907_s29 }
 0x4ca   : > { %v1562_v35 = vpop.f32.mrf.mxu3  ;;  %v1630_v36 = vpop.f32.mrf.mxu2 }
 0x4cc   : > { %v1608_v37 = vpop.f32.mrf.mxu1 }
 0x4d0   : > { %v1586_v38 = vpop.f32.mrf.mxu0 }
 0x4d1   : > { %1641 = vrot.lane.b32.xlu0 %v1628_v32, %s2908_s10 }
 0x4d2   : > { %v1564_v39 = vpop.f32.mrf.mxu3 }
 0x4d3   : > { %v2365_v39 = vld [vmem:[%s3332_s9] sm:$0xff] }
 0x51f   : > { %v1638_v45 = vpop.permute.xlu2 %1637 }
 0x53b   : > { %v1634_v43 = vpop.permute.xlu0 %1633 }
 0x53c   : > { %v1644_v44 = vsel %vm1403_vm12, %v1562_v35, %v1634_v43  ;;  %v2366_v35 = vld [vmem:[%s3332_s9 + $0x8] sm:$0xff] }
 0x53d   : > { %v1645_v46 = vsel %vm1495_vm13, %v1644_v44, %v1638_v45  ;;  %1874 = vmatpush.bf16.msra.mxu1 %v2366_v35 }
 0x541   : > { %1875 = vmatpush.bf16.msra.mxu1 %v2365_v39 }
 0x543   : > { %v1642_v47 = vpop.permute.xlu0 %1641 }
 0x544   : > { %v1647_v48 = vsel %vm1646_vm14, %v1645_v46, %v1642_v47 }
 0x545   : > { %v1648_v49 = vpack.c.bf16 %v1647_v48, %v1647_v48 }
 0x547   : > { %2300 = vmatmul.msk.bf16.vlgmr.msra.gmra.mxu3 %vm1122_vm1, %v1648_v49 }
 0x5ca   : > { %v1681_v51 = vpop.f32.mrf.mxu3 }
 0x5cb   : > { %v1682_v52 = vadd.f32 %v2547_v50, %v1681_v51 }
 0x5cd   : > { %v3448_v53 = vadd.f32 %v1682_v52, %v3340_v2 }
 0x5cf   : > { %v1688_v54 = vsel %vm1122_vm1, %v3448_v53, 0.0 }
 0x5d0   : > { %1689 = vadd.xlane.f32.xlu2 %v1688_v54 }
 0x5d2   : > { %v1683_v55 = vpop.f32.mrf.mxu3 }
 0x643   : > { %v1690_v56 = vpop.xlane.xlu2 %1689 }
 0x644   : > { %v1691_v57 = vmul.f32 %v1690_v56, %v3346_v13 }
 0x646   : > { %v1692_v58 = vsub.f32 %v3448_v53, %v1691_v57 }
 0x648   : > { %v1693_v59 = vmul.f32 %v1692_v58, %v1692_v58 }
 0x64a   : > { %v1694_v60 = vsel %vm1122_vm1, %v1693_v59, 0.0 }
 0x64b   : > { %1695 = vadd.xlane.f32.xlu0 %v1694_v60 }
 0x6be   : > { %v1696_v2 = vpop.xlane.xlu0 %1695 }
 0x6bf   : > { %v1697_v63 = vmul.f32 %v1696_v2, %v3346_v13  ;;  %v2549_v13 = vld [vmem:[%s1096_s20] ss:$0 sm:$0xff] }
 0x6c1   : > { %v1698_v0 = vadd.f32 1e-05, %v1697_v63 }
 0x6c3   : > { %2576 = vrsqrt.f32 %v1698_v0  ;;  %vm1705_vm0 = vweird.f32 %v1698_v0 }
 0x6c9   : > { %v2577_v1 = vpop.eup %2576 }
 0x6ca   : > { %v1700_v3 = vmul.f32 %v2577_v1, %v1698_v0  ;;  %vm1706_vm15 = vweird.f32 %v2577_v1 }
 0x6cb   : > { %vm1707_vm2 = vmor %vm1705_vm0, %vm1706_vm15 }
 0x6cc   : > { %v1701_v4 = vmul.f32 %v2577_v1, %v1700_v3 }
 0x6ce   : > { %v1702_v5 = vmul.f32 0.5, %v1701_v4  ;;  %v2551_v4 = vld [vmem:[%s1107_s3] ss:$0 sm:$0xff] }
 0x6d0   : > { %v1703_v6 = vsub.f32 1.5, %v1702_v5 }
 0x6d2   : > { %v1704_v7 = vmul.f32 %v2577_v1, %v1703_v6 }
 0x6d4   : > { %v1708_v9 = vsel %vm1707_vm2, %v2577_v1, %v1704_v7 }
 0x6d5   : > { %v1709_v10 = vmul.f32 %v1708_v9, %v1692_v58 }
 0x6d7   : > { %v1713_v11 = vmul.f32 %v2548_v8, %v1709_v10 }
 0x6d9   : > { %v1717_v12 = vadd.f32 %v2549_v13, %v1713_v11 }
 0x6db   : > { %v1718_v42 = vpack.c.bf16 %v1717_v12, %v1717_v12 }
 0x6dd   : > { %2309 = vmatmul.msk.bf16.vlgmr.msrb.gmra.mxu0 %vm1122_vm1, %v1718_v42 }
 0x75a   : > { %v1751_v17 = vpop.f32.mrf.mxu0 }
 0x75b   : > { %v1752_v19 = vadd.f32 %v2550_v16, %v1751_v17 }
 0x75d   : > { %v1756_v20 = vmul.f32 0.70710677, %v1752_v19  ;;  %v1755_v63 = vmul.f32 0.5, %v1752_v19 }
 0x75f   : > { %v1757_v22 = vmul.f32 %v1756_v20, %v1756_v20 }
 0x761   : > { %v1758_v23 = vmin.f32 %v1757_v22, 16.0 }
 0x762   : > { %v1753_v24 = vpop.f32.mrf.mxu0 }
 0x763   : > { %v1759_v26 = vmul.f32 2.1237322e-06, %v1758_v23  ;;  %v1770_v27 = vmul.f32 3.8918573e-05, %v1758_v23 }
 0x765   : > { %v1760_v28 = vadd.f32 0.00028619796, %v1759_v26  ;;  %v1771_v29 = vadd.f32 0.001143296, %v1770_v27 }
 0x767   : > { %v1761_v31 = vmul.f32 %v1760_v28, %v1758_v23  ;;  %v1772_v32 = vmul.f32 %v1771_v29, %v1758_v23 }
 0x769   : > { %v1773_v33 = vadd.f32 0.014752088, %v1772_v32  ;;  %v1762_v34 = vadd.f32 0.0036580483, %v1761_v31 }
 0x76b   : > { %v1774_v36 = vmul.f32 %v1773_v33, %v1758_v23  ;;  %v1763_v38 = vmul.f32 %v1762_v34, %v1758_v23 }
 0x76d   : > { %v1775_v37 = vadd.f32 0.112945676, %v1774_v36  ;;  %v1764_v43 = vadd.f32 0.05243302, %v1763_v38 }
 0x76f   : > { %v1776_v40 = vmul.f32 %v1775_v37, %v1758_v23  ;;  %v1765_v46 = vmul.f32 %v1764_v43, %v1758_v23 }
 0x771   : > { %v1777_v41 = vadd.f32 0.4994258, %v1776_v40  ;;  %v1766_v47 = vadd.f32 0.18741608, %v1765_v46 }
 0x773   : > { %v1778_v44 = vmul.f32 %v1777_v41, %v1758_v23  ;;  %v1767_v49 = vmul.f32 %v1766_v47, %v1758_v23 }
 0x775   : > { %v1779_v45 = vadd.f32 1.0, %v1778_v44  ;;  %v1768_v54 = vadd.f32 1.1283791, %v1767_v49 }
 0x777   : > { %2578 = vrcp.f32 %v1779_v45  ;;  %v1791_v52 = vand.u32 2147483648, %v1779_v45  ;;  %v1789_v56 = vand.u32 2147483647, %v1779_v45  ;;  %vm1785_vm4 = vweird.f32 %v1779_v45 }
 0x778   : > { %v1769_v59 = vmul.f32 %v1768_v54, %v1756_v20 }
 0x779   : > { %v1792_v58 = vor.u32 1.1754944e-38, %v1791_v52  ;;  %vm1790_vm6 = vcmp.eq.f32.partialorder %v1789_v56, 8.507059e+37 }
 0x77d   : > { %v2579_v48 = vpop.eup %2578 }
 0x77e   : > { %v1781_v50 = vmul.f32 %v2579_v48, %v1779_v45  ;;  %vm1786_vm3 = vweird.f32 %v2579_v48 }
 0x77f   : > { %vm1787_vm5 = vmor %vm1785_vm4, %vm1786_vm3 }
 0x780   : > { %v1782_v51 = vsub.f32 1.0, %v1781_v50 }
 0x782   : > { %v1783_v55 = vmul.f32 %v2579_v48, %v1782_v51 }
 0x784   : > { %v1784_v57 = vadd.f32 %v2579_v48, %v1783_v55 }
 0x786   : > { %v1788_v60 = vsel %vm1787_vm5, %v2579_v48, %v1784_v57 }
 0x787   : > { %v1793_v61 = vsel %vm1790_vm6, %v1792_v58, %v1788_v60 }
 0x788   : > { %v1794_v62 = vmul.f32 %v1793_v61, %v1769_v59 }
 0x78a   : > { %v2310_v2 = vclamps-f32 %v1794_v62, 1.0 }
 0x78c   : > { %v1797_v0 = vadd.f32 1.0, %v2310_v2 }
 0x78e   : > { %v1798_v1 = vmul.f32 %v1797_v0, %v1755_v63 }
 0x790   : > { %v1799_v3 = vpack.c.bf16 %v1798_v1, %v1798_v1 }
 0x792   : > { %1876 = vmatmul.bf16.vlgmr.msra.gmra.mxu1 %v1799_v3 }
 0x80f   : > { %v1877_v5 = vpop.f32.mrf.mxu1 }
 0x810   : > { %v1878_v6 = vadd.f32 %v2551_v4, %v1877_v5 }
 0x812   : > { %v1881_v7 = vadd.f32 %v1878_v6, %v3448_v53 }
 0x813   : > { %1886 = sbr.rel (%p2343_p3) target bundleno = 2073 (0x819), region = 136 }
 0x814   : > { %1882 = vst.msk [vmem:[#allocation2] sm:$0xff] %vm1122_vm1, %v1881_v7 }
 0x817   : > { %v1879_v8 = vpop.f32.mrf.mxu1 }
 0x818   : > { %1887 = vst.msk [vmem:[%s3336_s7] sm:$0xff] %vm1122_vm1, %v1881_v7 }
 0x819 PF: > { %s3684_s17 = sld [smem:[#allocation27_spill]]  ;;  %s1901_s11 = sshll.u32 %s3336_s7, 4  ;;  %s1902_s11 = int_to_ptr.vmem [resolvable:$true] %s1901_s11 }
 0x81a   : > { %s3686_s4 = sld [smem:[#allocation60_spill]]  ;;  %s1889_s0 = scalar_lea.sflag [#allocation5], %s3222_s24 }
 0x81f   : > { %s2345_s21 = sshll.u32 %s3684_s17, 3 }
 0x820   : > { %s3687_s15 = smov %s3686_s4  ;;  %s1899_s28 = scalar_lea.hbm %s3686_s4, %s2345_s21 }
 0x821   : > { %s1903_s30 = sshll.u32 %s1899_s28, 4  ;;  %s2780_s13 = scalar_lea.hbm %s3687_s15, 16  ;;  %s1904_s30 = int_to_ptr.hbm [resolvable:$true] %s1903_s30 }
 0x822   : > { %s2774_s16 = sshra.s32 %s1904_s30, 4  ;;  %s2775_s16 = int_to_ptr.hbm [resolvable:$true] %s2774_s16 }
 0x823   : > { %s2776_s29 = scalar_lea.hbm %s2775_s16, 8  ;;  %p2781_p6 = scmp.lt.s32.totalorder %s2775_s16, %s3687_s15 }
 0x824   : > { %p2777_p0 = scmp.ne.s32.totalorder %s2775_s16, %s2776_s29  ;;  %p2782_p7 = scmp.lt.s32.totalorder %s2780_s13, %s2776_s29 }
 0x826   : > { %p2778_p2 = pnand %p2777_p0, %p3111_p12  ;;  %p2783_p8 = por %p2782_p7, %p2781_p6 }
 0x828   : > { %p2779_p4 = pneg %p2778_p2 }
 0x82a   : > { %p2784_p9 = pnand %p2783_p8, %p2779_p4 }
 0x82c   : > { %2787 = shalt.err (!%p2784_p9)
}
 0x82d   : > { %2385 = dma.vmem_to_hbm [thread:$0]  (%p3111_p12), %s1902_s11, 128, %s1904_s30, %s1889_s0  }
 0x82e PF: > { %s3688_s24 = sld [smem:[#allocation30_spill]] }
 0x82f   : > { %s3689_s7 = sld [smem:[#allocation23_spill]] }
 0x834   : > { %p2411_p10 = scmp.ge.s32.totalorder %s3688_s24, 2 }
 0x835   : > { %s1915_s23 = sand.u32 1, %s3689_s7  }
 0x836   : > { %p2407_p5 = pnand %p2411_p10, %p3115_p13  ;;  %s1916_s1 = scalar_lea.sflag [#allocation5], %s1915_s23 }
 0x838   : > { %p2408_p1 = pneg %p2407_p5 }
 0x83a   : > { %2853 = dma.done.wait (%p2408_p1), %s1916_s1, 128  }
 0x83b   : > { %2855 = vsyncadd (%p2408_p1), %s1916_s1, 4294967168  ;;  %s46_s5 = sadd.s32 1, %s3688_s24   ;;  %s3691_s2 = sld [smem:[#allocation21_spill]] }
 0x83c   : > { %p43_p11 = scmp.ge.s32.totalorder %s46_s5, 6   ;;  %s3692_s25 = sld [smem:[#allocation22_spill]] }
 0x83d   : > { %s3693_s26 = sld [smem:[#allocation36_spill]] }
 0x83e   : > { %s3694_s27 = sld [smem:[#allocation24_spill]] }
 0x83f   : > { %s3695_s3 = sld [smem:[#allocation25_spill]] }
 0x840   : > { %s3696_s28 = sld [smem:[#allocation37_spill]]  ;;  %45 = sbr.rel (!%p43_p11) target bundleno = 38 (0x26), region = 263 }
 0x841   : > { %s3697_s29 = sld [smem:[#allocation28_spill]] }
 0x842   : > { %s3698_s0 = sld [smem:[#allocation29_spill]] }
 0x843   : > { %s3699_s4 = sld [smem:[#allocation34_spill]] }
 0x844   : > { %s3700_s30 = sld [smem:[#allocation35_spill]] }
 0x845   :  { %1922 = vsyncpa [#allocation4], 1 }
 0x846   :  { %1924 = vsyncpa [#allocation4 + $0x1], 1 }
 0x847   :  { %1925 = vsyncpa [#allocation7], 1 }
 0x848   :  { %1927 = vsyncpa [#allocation7 + $0x1], 1 }
 0x849   :  { %1928 = vsyncpa [#allocation10], 1 }
 0x84a   :  { %1930 = vsyncpa [#allocation10 + $0x1], 1 }
 0x84b   :  { %1931 = vsyncpa [#allocation13], 1 }
 0x84c   :  { %1933 = vsyncpa [#allocation13 + $0x1], 1 }
 0x84d   :  { %1934 = vsyncpa [#allocation5], 1 }
 0x84e   :  { %1936 = vsyncpa [#allocation5 + $0x1], 1 }

</bundles_post_ra>
